<compile_context>
chip_gen: v6e
topology: v6e:2x2x1
jax: 0.10.0
libtpu: 0.0.40
codegen_flags: <defaults>
</compile_context>

<pallas_src>
import math

import jax
import jax.numpy as jnp
import numpy as np
from jax.experimental import pallas as pl
from jax.experimental.pallas import tpu as pltpu

_SELU_ALPHA = 1.6732632423543772848170429916717
_SELU_SCALE = 1.0507009873554804934193349852946
_LN_EPS = 1e-6          # timm ViT norm layer uses eps=1e-6
_LOG_2PI = math.log(2.0 * math.pi)
_LANES = 128            # packed output / fused hidden width (unmasked vst, one MXU pass)


def _round_up(x, m):
    return ((x + m - 1) // m) * m


def _selu(x):
    # SELU with exp clamped on the positive branch so the unselected lane never overflows.
    neg = _SELU_ALPHA * (jnp.exp(jnp.minimum(x, 0.0)) - 1.0)
    return _SELU_SCALE * jnp.where(x > 0, x, neg)


# ----------------------------- kernel -----------------------------

def _make_kernel(gap, sp, s_dim, act_dim, compute_dtype):
    """Kernel factory; gap/sp/s_dim/act_dim and the matmul dtype are static constants."""
    off_ws = gap                 # rows of the (fused) state-encoder weights inside the slab
    off_w1 = gap + sp            # rows of the fused (block-diag) layer-1 weights
    off_w2 = off_w1 + _LANES     # rows of the fused head weights

    def kernel(obs_ref, st_ref, act_ref, w_ref, v_ref, out_ref):
        f32 = jnp.float32
        cd = compute_dtype
        x = obs_ref[...].astype(f32)                              # (TB, GAP)

        # LayerNorm (gamma/beta already folded into the fused layer-0 weights/bias).
        mu = jnp.mean(x, axis=-1, keepdims=True)
        var = jnp.mean(x * x, axis=-1, keepdims=True) - mu * mu   # one-pass variance
        var = jnp.maximum(var, 0.0)                               # guard catastrophic cancel
        xn = (x - mu) * jax.lax.rsqrt(var + _LN_EPS)

        # Static, aligned slices of the packed parameter slabs (no extra DMAs).
        wo = w_ref[0:gap, :]                                      # (GAP, 128)
        ws = w_ref[off_ws:off_ws + sp, :]                         # (Sp,  128)
        w1 = w_ref[off_w1:off_w1 + _LANES, :]                     # (128, 128) block-diag
        w2 = w_ref[off_w2:off_w2 + _LANES, :]                     # (128, 128) heads
        b0 = v_ref[0:1, :]
        b1 = v_ref[1:2, :]
        b2 = v_ref[2:3, :]
        inv_scale = v_ref[3:4, :]                                 # exp(-2*log_std), 0 beyond A

        # States arrive with their natural width; zero-extend lanes to the 8-aligned slab width.
        st = st_ref[...].astype(f32)
        if sp != s_dim:
            st = jnp.concatenate(
                [st, jnp.zeros((st.shape[0], sp - s_dim), f32)], axis=-1)

        # Fused layer 0: LN-affine + projector + state-enc + actor/critic layer 0, all composed.
        h = _selu(jnp.dot(xn.astype(cd), wo, preferred_element_type=f32)
                  + jnp.dot(st.astype(cd), ws, preferred_element_type=f32)
                  + b0.astype(f32))                               # (TB, 128): [h_actor|h_critic|0]
        h = _selu(jnp.dot(h.astype(cd), w1, preferred_element_type=f32) + b1.astype(f32))
        head = jnp.dot(h.astype(cd), w2, preferred_element_type=f32) + b2.astype(f32)
        # head (TB, 128): lanes [0:A) = actions_mean, lane A = value, rest = 0.

        # Mahalanobis term of MVN(mean, scale_tril=diag(exp(log_std)^2)) — narrow A-lane math.
        act = act_ref[...].astype(f32)                            # (TB, A)
        z = (act - head[:, :act_dim]) * inv_scale[:, :act_dim].astype(f32)
        maha = jnp.sum(z * z, axis=-1, keepdims=True)             # (TB, 1)

        # Single lane-dense packed store: lane A+1 carries maha, everything else is `head`.
        lane = jax.lax.broadcasted_iota(jnp.int32, head.shape, 1)
        maha_b = jnp.broadcast_to(maha, head.shape)
        out_ref[...] = jnp.where(lane == act_dim + 1, maha_b, head).astype(out_ref.dtype)

    return kernel


# ----------------------------- parameter packing -----------------------------

def pack_params(p, *, gap_dim, states_dim, actions_dim):
    """Fold encoder/state-enc/LN into layer 0, fuse actor+critic block-diagonally, and pack
    everything into one weight slab + one (8,128) vector slab (done once, outside the kernel)."""
    f32 = jnp.float32
    a_dim = actions_dim
    h0a, h0c = p["ba0"].shape[1], p["bc0"].shape[1]
    h1a, h1c = p["ba1"].shape[1], p["bc1"].shape[1]
    hid0, hid1 = h0a + h0c, h1a + h1c
    assert gap_dim % 8 == 0, "LayerNorm feature dim must be a multiple of 8"
    assert hid0 <= _LANES and hid1 <= _LANES and a_dim + 2 <= _LANES

    w0o = jnp.concatenate([p["wa0o"], p["wc0o"]], axis=1)         # (E, H0)
    w0s = jnp.concatenate([p["wa0s"], p["wc0s"]], axis=1)         # (E, H0)
    # Compose: selu( LN(x)@wp@W0o + states@ws@W0s + folded bias ), LN gamma/beta folded in.
    wo = (p["ln_g"].reshape(-1, 1) * p["wp"]) @ w0o               # (GAP, H0)
    ws = p["ws"] @ w0s                                            # (S,   H0)
    b0 = ((p["ln_b"] @ p["wp"] + p["bp"]) @ w0o
          + p["bs"] @ w0s
          + jnp.concatenate([p["ba0"], p["bc0"]], axis=1))        # (1, H0)

    w1 = jnp.zeros((_LANES, _LANES), f32)
    w1 = w1.at[:h0a, :h1a].set(p["wa1"])
    w1 = w1.at[h0a:h0a + h0c, h1a:h1a + h1c].set(p["wc1"])
    b1 = jnp.zeros((1, _LANES), f32)
    b1 = b1.at[:, :h1a].set(p["ba1"]).at[:, h1a:h1a + h1c].set(p["bc1"])

    w2 = jnp.zeros((_LANES, _LANES), f32)
    w2 = w2.at[:h1a, :a_dim].set(p["wa2"])
    w2 = w2.at[h1a:h1a + h1c, a_dim:a_dim + 1].set(p["wc2"])
    b2 = jnp.zeros((1, _LANES), f32)
    b2 = b2.at[:, :a_dim].set(p["ba2"]).at[:, a_dim:a_dim + 1].set(p["bc2"])

    sp = _round_up(states_dim, 8)
    wo_pad = jnp.pad(wo, ((0, 0), (0, _LANES - hid0)))
    ws_pad = jnp.pad(ws, ((0, sp - states_dim), (0, _LANES - hid0)))
    wslab = jnp.concatenate([wo_pad, ws_pad, w1, w2], axis=0).astype(f32)

    inv_scale = jnp.zeros((1, _LANES), f32).at[:, :a_dim].set(jnp.exp(-2.0 * p["log_std"]))
    b0_pad = jnp.pad(b0, ((0, 0), (0, _LANES - hid0)))
    vslab = jnp.concatenate([b0_pad, b1, b2, inv_scale,
                             jnp.zeros((4, _LANES), f32)], axis=0).astype(f32)

    return {"wslab": wslab, "wslab_bf16": wslab.astype(jnp.bfloat16), "vslab": vslab,
            "log_std": p["log_std"].astype(f32),
            "gap": gap_dim, "sp": sp, "s_dim": states_dim, "act_dim": a_dim}


# ----------------------------- forward wrapper -----------------------------

def pixel_actor_critic_forward(obs_features, states, actions, packed, *, step=0,
                               block_b=512, use_bf16=False):
    """Fused Pallas forward. Returns (log_prob, entropy, value, actions_mean, log_std_rep)."""
    del step  # 'learned' action-noise: log_std is a parameter; step unused.
    f32 = jnp.float32
    batch, gap = obs_features.shape
    s_dim = states.shape[1]
    a_dim = actions.shape[1]
    sp = packed["sp"]
    assert gap == packed["gap"] and a_dim == packed["act_dim"] and s_dim == packed["s_dim"]

    # --- batch tile selection (big tiles amortize the ~0.35 us/step overhead; cap for VMEM) ---
    bp8 = _round_up(batch, 8)
    tb = max(8, min(_round_up(block_b, 8), bp8))
    # Double-buffered in/out tiles + f32 intermediates per batch row, rough upper bound:
    per_row = 4 * (2 * (gap + s_dim + a_dim + _LANES) + 6 * _LANES + gap)
    tb_cap = max(8, (((24 << 20) // max(per_row, 1)) // 8) * 8)   # stay under v7x scoped budget
    tb = min(tb, tb_cap)
    bp = _round_up(bp8, tb)

    # Only the batch (sublane) dim is ever padded; lanes pass through untouched (no fat copies).
    def pad_rows(x):
        return x if x.shape[0] == bp else jnp.pad(x, ((0, bp - x.shape[0]), (0, 0)))

    obs_p, st_p, act_p = pad_rows(obs_features), pad_rows(states), pad_rows(actions)

    wslab = packed["wslab_bf16"] if use_bf16 else packed["wslab"]
    vslab = packed["vslab"]
    n_w = wslab.shape[0]

    vmem_bytes = int(2 * wslab.size * wslab.dtype.itemsize + 2 * vslab.size * 4
                     + 2 * tb * 4 * (gap + s_dim + a_dim + _LANES)
                     + 8 * tb * _LANES * 4 + (4 << 20))
    vmem_bytes = min(max(vmem_bytes, 16 << 20), 64 << 20)

    kernel = _make_kernel(gap, sp, s_dim, a_dim, jnp.bfloat16 if use_bf16 else f32)
    grid = (bp // tb,)

    def run(single_buffer_weights):
        resident_kw = {"pipeline_mode": pl.Buffered(1)} if single_buffer_weights else {}
        in_specs = [
            pl.BlockSpec((tb, gap), lambda i: (i, 0)),              # obs features (batch-tiled)
            pl.BlockSpec((tb, s_dim), lambda i: (i, 0)),            # states, natural width
            pl.BlockSpec((tb, a_dim), lambda i: (i, 0)),            # actions, natural width
            pl.BlockSpec((n_w, _LANES), lambda i: (0, 0), **resident_kw),   # packed weights
            pl.BlockSpec((8, _LANES), lambda i: (0, 0), **resident_kw),     # biases / scales
        ]
        out = pl.pallas_call(
            kernel,
            out_shape=jax.ShapeDtypeStruct((bp, _LANES), f32),
            grid=grid,
            in_specs=in_specs,
            out_specs=pl.BlockSpec((tb, _LANES), lambda i: (i, 0)),
            compiler_params=pltpu.CompilerParams(
                dimension_semantics=("parallel",),                  # megacore-shardable batch
                vmem_limit_bytes=vmem_bytes),
        )(obs_p, st_p, act_p, wslab, vslab)
        return jax.block_until_ready(out)

    try:
        out = run(True)           # single-buffer the resident slabs (they never change)
    except Exception:             # fall back if Buffered(1) is rejected by this jax version
        out = run(False)

    mean = out[:batch, :a_dim]
    value = out[:batch, a_dim:a_dim + 1]
    maha = out[:batch, a_dim + 1]

    # log_std-only quantities live outside the kernel (no batch dependence).
    log_std = packed["log_std"]                                  # (1, A)
    log_det = jnp.sum(2.0 * log_std)                             # log|det scale_tril|
    logp = -0.5 * maha - log_det - 0.5 * a_dim * _LOG_2PI
    ent = jnp.broadcast_to(0.5 * a_dim * (1.0 + _LOG_2PI) + log_det, (batch,))
    log_std_rep = jnp.broadcast_to(log_std, (batch, a_dim))
    return logp, ent, value, mean, log_std_rep


# ---------------- parameter construction (deterministic, synthetic) ----------------

def _linear(key, fan_in, fan_out, gain):
    # Deterministic stand-in for orthogonal init: scaled normal. Bias = 0.
    w = gain * jax.random.normal(key, (fan_in, fan_out), jnp.float32) / np.sqrt(fan_in)
    b = jnp.zeros((1, fan_out), jnp.float32)
    return w, b


def make_params(key, gap_dim, states_dim, emb_dim, actor_hidden, critic_hidden,
                actions_dim, initial_std):
    ks = jax.random.split(key, 16)
    p = {}
    # Encoder: backbone.forward_norm (LayerNorm affine) + projector Linear
    p["ln_g"] = jnp.ones((1, gap_dim), jnp.float32) + 0.01 * jax.random.normal(ks[0], (1, gap_dim))
    p["ln_b"] = 0.01 * jax.random.normal(ks[1], (1, gap_dim))
    p["wp"], p["bp"] = _linear(ks[2], gap_dim, emb_dim, 1.0)
    # state encoder
    p["ws"], p["bs"] = _linear(ks[3], states_dim, emb_dim, 1.0)
    # actor: Linear(2E,h0) SELU Linear(h0,h1) SELU Linear(h1,A); gains [sqrt2, sqrt2, 0.01]
    wa0, p["ba0"] = _linear(ks[4], 2 * emb_dim, actor_hidden[0], np.sqrt(2))
    p["wa0o"], p["wa0s"] = wa0[:emb_dim], wa0[emb_dim:]
    p["wa1"], p["ba1"] = _linear(ks[5], actor_hidden[0], actor_hidden[1], np.sqrt(2))
    p["wa2"], p["ba2"] = _linear(ks[6], actor_hidden[1], actions_dim, 0.01)
    # critic: Linear(2E,h0) SELU Linear(h0,h1) SELU Linear(h1,1); gains [sqrt2, sqrt2, 1.0]
    wc0, p["bc0"] = _linear(ks[7], 2 * emb_dim, critic_hidden[0], np.sqrt(2))
    p["wc0o"], p["wc0s"] = wc0[:emb_dim], wc0[emb_dim:]
    p["wc1"], p["bc1"] = _linear(ks[8], critic_hidden[0], critic_hidden[1], np.sqrt(2))
    p["wc2"], p["bc2"] = _linear(ks[9], critic_hidden[1], 1, 1.0)
    # learned action noise: log_std = log(initial_std) * ones(A)
    p["log_std"] = jnp.full((1, actions_dim), np.log(initial_std), jnp.float32)
    return p


# ---------------- pure-JAX reference (unfused params) for verification ----------------

def reference_forward(obs_features, states, actions, p):
    x = obs_features
    mu = x.mean(-1, keepdims=True)
    var = ((x - mu) ** 2).mean(-1, keepdims=True)
    xn = (x - mu) / jnp.sqrt(var + _LN_EPS) * p["ln_g"] + p["ln_b"]
    obs_emb = xn @ p["wp"] + p["bp"]
    state_emb = states @ p["ws"] + p["bs"]
    joint = jnp.concatenate([obs_emb, state_emb], axis=1)
    wa0 = jnp.concatenate([p["wa0o"], p["wa0s"]], axis=0)
    wc0 = jnp.concatenate([p["wc0o"], p["wc0s"]], axis=0)
    h = jax.nn.selu(joint @ wa0 + p["ba0"])
    h = jax.nn.selu(h @ p["wa1"] + p["ba1"])
    mean = h @ p["wa2"] + p["ba2"]
    c = jax.nn.selu(joint @ wc0 + p["bc0"])
    c = jax.nn.selu(c @ p["wc1"] + p["bc1"])
    value = c @ p["wc2"] + p["bc2"]
    a_dim = mean.shape[-1]
    s = jnp.exp(2.0 * p["log_std"])
    z = (actions - mean) / s
    logp = -0.5 * jnp.sum(z * z, -1) - jnp.sum(2.0 * p["log_std"]) - 0.5 * a_dim * _LOG_2PI
    ent = jnp.broadcast_to(0.5 * a_dim * (1.0 + _LOG_2PI) + jnp.sum(2.0 * p["log_std"]),
                           (mean.shape[0],))
    log_std_rep = jnp.broadcast_to(p["log_std"], mean.shape)
    return logp, ent, value, mean, log_std_rep


if __name__ == "__main__":
    # Small shapes implied by forward(): obs_features (B, gap_dim), states (B, S), actions (B, A).
    B, GAP, S_DIM, EMB, A = 64, 48, 12, 32, 8
    ACTOR_HID = [32, 32]
    CRITIC_HID = [32, 32]
    INITIAL_STD = 0.8

    key = jax.random.PRNGKey(0)
    kp, kx, ks, ka, kx2, ks2, ka2 = jax.random.split(key, 7)
    params = make_params(kp, GAP, S_DIM, EMB, ACTOR_HID, CRITIC_HID, A, INITIAL_STD)
    packed = pack_params(params, gap_dim=GAP, states_dim=S_DIM, actions_dim=A)

    obs_features = jax.random.normal(kx, (B, GAP), jnp.float32)
    states = jax.random.normal(ks, (B, S_DIM), jnp.float32)
    actions = jax.random.normal(ka, (B, A), jnp.float32)

    # 1) f32 path, default (large) tile: batch fits in one tile, no wrapper pads at all.
    out = pixel_actor_critic_forward(obs_features, states, actions, packed)
    out = jax.block_until_ready(out)
    ref = reference_forward(obs_features, states, actions, params)
    # Tolerance slightly looser than 1e-4: offline weight pre-composition changes fp association.
    for got, want in zip(out, ref):
        np.testing.assert_allclose(np.asarray(got), np.asarray(want), rtol=5e-4, atol=5e-4)

    # 2) f32 path, ragged batch / multi-tile grid (exercises the padded last tile + pipelining).
    B2 = 200
    obs2 = jax.random.normal(kx2, (B2, GAP), jnp.float32)
    st2 = jax.random.normal(ks2, (B2, S_DIM), jnp.float32)
    act2 = jax.random.normal(ka2, (B2, A), jnp.float32)
    out2 = jax.block_until_ready(
        pixel_actor_critic_forward(obs2, st2, act2, packed, block_b=64))
    ref2 = reference_forward(obs2, st2, act2, params)
    for got, want in zip(out2, ref2):
        np.testing.assert_allclose(np.asarray(got), np.asarray(want), rtol=5e-4, atol=5e-4)

    # 3) bf16-MXU path (bf16 weights/dot operands, f32 accumulation and elementwise math).
    out3 = jax.block_until_ready(
        pixel_actor_critic_forward(obs_features, states, actions, packed, use_bf16=True))
    for got, want in zip(out3, ref):
        np.testing.assert_allclose(np.asarray(got), np.asarray(want), rtol=5e-2, atol=5e-2)

    # TODO(synk): act()/act_inference() paths (ViT backbone.extract_feat + MVN sampling) and the
    # 'scheduled' action-noise branch are outside forward(obs_features,...) semantics; scheduled
    # noise can be supported by recomputing log_std/inv_scale in pack_params each step.
    print("KERNEL_OK")
</pallas_src>

<mosaic_0001>
module attributes {stable_mosaic.version = 11 : i64} {
  func.func @kernel(%arg0: i32, %arg1: memref<64x48xf32, #tpu.memory_space<vmem>>, %arg2: memref<64x12xf32, #tpu.memory_space<vmem>>, %arg3: memref<64x8xf32, #tpu.memory_space<vmem>>, %arg4: memref<320x128xf32, #tpu.memory_space<vmem>>, %arg5: memref<8x128xf32, #tpu.memory_space<vmem>>, %arg6: memref<64x128xf32, #tpu.memory_space<vmem>>) attributes {dimension_semantics = [#tpu.dimension_semantics<parallel>], iteration_bounds = array<i64: 1>, scalar_prefetch = 0 : i64, scratch_operands = 0 : i64, tpu.core_type = #tpu.core_type<tc>, window_params = [{transform_indices = @transform_0, window_bounds = array<i64: 64, 48>}, {transform_indices = @transform_1, window_bounds = array<i64: 64, 12>}, {transform_indices = @transform_2, window_bounds = array<i64: 64, 8>}, {pipeline_mode = #tpu.pipeline_mode<synchronous>, transform_indices = @transform_3, window_bounds = array<i64: 320, 128>}, {pipeline_mode = #tpu.pipeline_mode<synchronous>, transform_indices = @transform_4, window_bounds = array<i64: 8, 128>}, {transform_indices = @transform_5, window_bounds = array<i64: 64, 128>}]} {
    %c0 = arith.constant 0 : index
    %c0_0 = arith.constant 0 : index
    %0 = vector.load %arg1[%c0, %c0_0] : memref<64x48xf32, #tpu.memory_space<vmem>>, vector<64x48xf32>
    %cst = arith.constant dense<0.000000e+00> : vector<64xf32>
    %1 = vector.multi_reduction <add>, %0, %cst [1] : vector<64x48xf32> to vector<64xf32>
    %2 = vector.shape_cast %1 : vector<64xf32> to vector<64x1xf32>
    %cst_1 = arith.constant 4.800000e+01 : f32
    %3 = vector.broadcast %cst_1 : f32 to vector<64x1xf32>
    %4 = arith.divf %2, %3 : vector<64x1xf32>
    %5 = arith.mulf %0, %0 : vector<64x48xf32>
    %cst_2 = arith.constant dense<0.000000e+00> : vector<64xf32>
    %6 = vector.multi_reduction <add>, %5, %cst_2 [1] : vector<64x48xf32> to vector<64xf32>
    %7 = vector.shape_cast %6 : vector<64xf32> to vector<64x1xf32>
    %cst_3 = arith.constant 4.800000e+01 : f32
    %8 = vector.broadcast %cst_3 : f32 to vector<64x1xf32>
    %9 = arith.divf %7, %8 : vector<64x1xf32>
    %10 = arith.mulf %4, %4 : vector<64x1xf32>
    %11 = arith.subf %9, %10 : vector<64x1xf32>
    %cst_4 = arith.constant 0.000000e+00 : f32
    %12 = vector.broadcast %cst_4 : f32 to vector<64x1xf32>
    %13 = arith.maximumf %11, %12 : vector<64x1xf32>
    %14 = vector.broadcast %4 : vector<64x1xf32> to vector<64x48xf32>
    %15 = arith.subf %0, %14 : vector<64x48xf32>
    %cst_5 = arith.constant 9.99999997E-7 : f32
    %16 = vector.broadcast %cst_5 : f32 to vector<64x1xf32>
    %17 = arith.addf %13, %16 : vector<64x1xf32>
    %18 = math.rsqrt %17 : vector<64x1xf32>
    %19 = vector.broadcast %18 : vector<64x1xf32> to vector<64x48xf32>
    %20 = arith.mulf %15, %19 : vector<64x48xf32>
    %c0_6 = arith.constant 0 : index
    %c0_7 = arith.constant 0 : index
    %21 = vector.load %arg4[%c0_6, %c0_7] : memref<320x128xf32, #tpu.memory_space<vmem>>, vector<48x128xf32>
    %c48 = arith.constant 48 : index
    %c0_8 = arith.constant 0 : index
    %22 = vector.load %arg4[%c48, %c0_8] : memref<320x128xf32, #tpu.memory_space<vmem>>, vector<16x128xf32>
    %c64 = arith.constant 64 : index
    %c0_9 = arith.constant 0 : index
    %23 = vector.load %arg4[%c64, %c0_9] : memref<320x128xf32, #tpu.memory_space<vmem>>, vector<128x128xf32>
    %c192 = arith.constant 192 : index
    %c0_10 = arith.constant 0 : index
    %24 = vector.load %arg4[%c192, %c0_10] : memref<320x128xf32, #tpu.memory_space<vmem>>, vector<128x128xf32>
    %c0_11 = arith.constant 0 : index
    %c0_12 = arith.constant 0 : index
    %25 = vector.load %arg5[%c0_11, %c0_12] : memref<8x128xf32, #tpu.memory_space<vmem>>, vector<1x128xf32>
    %c1 = arith.constant 1 : index
    %c0_13 = arith.constant 0 : index
    %26 = vector.load %arg5[%c1, %c0_13] : memref<8x128xf32, #tpu.memory_space<vmem>>, vector<1x128xf32>
    %c2 = arith.constant 2 : index
    %c0_14 = arith.constant 0 : index
    %27 = vector.load %arg5[%c2, %c0_14] : memref<8x128xf32, #tpu.memory_space<vmem>>, vector<1x128xf32>
    %c3 = arith.constant 3 : index
    %c0_15 = arith.constant 0 : index
    %28 = vector.load %arg5[%c3, %c0_15] : memref<8x128xf32, #tpu.memory_space<vmem>>, vector<1x128xf32>
    %c0_16 = arith.constant 0 : index
    %c0_17 = arith.constant 0 : index
    %29 = vector.load %arg2[%c0_16, %c0_17] : memref<64x12xf32, #tpu.memory_space<vmem>>, vector<64x12xf32>
    %cst_18 = arith.constant 0.000000e+00 : f32
    %30 = vector.broadcast %cst_18 : f32 to vector<64x4xf32>
    %31 = tpu.concatenate %29, %30 in 1 : vector<64x12xf32>, vector<64x4xf32> -> vector<64x16xf32>
    %cst_19 = arith.constant dense<0.000000e+00> : vector<64x128xf32>
    %32 = tpu.matmul %20, %21, %cst_19 {dimension_numbers = #tpu.dot_dimension_numbers<[1], [0], [0], [1], [0, 0, 1, 1], [], []>} : vector<64x48xf32>, vector<48x128xf32>, vector<64x128xf32> -> vector<64x128xf32>
    %cst_20 = arith.constant dense<0.000000e+00> : vector<64x128xf32>
    %33 = tpu.matmul %31, %22, %cst_20 {dimension_numbers = #tpu.dot_dimension_numbers<[1], [0], [0], [1], [0, 0, 1, 1], [], []>} : vector<64x16xf32>, vector<16x128xf32>, vector<64x128xf32> -> vector<64x128xf32>
    %34 = arith.addf %32, %33 : vector<64x128xf32>
    %35 = vector.broadcast %25 : vector<1x128xf32> to vector<64x128xf32>
    %36 = arith.addf %34, %35 : vector<64x128xf32>
    %cst_21 = arith.constant 0.000000e+00 : f32
    %37 = vector.broadcast %cst_21 : f32 to vector<64x128xf32>
    %38 = arith.minimumf %36, %37 : vector<64x128xf32>
    %39 = math.exp %38 : vector<64x128xf32>
    %cst_22 = arith.constant 1.000000e+00 : f32
    %40 = vector.broadcast %cst_22 : f32 to vector<64x128xf32>
    %41 = arith.subf %39, %40 : vector<64x128xf32>
    %cst_23 = arith.constant 1.67326319 : f32
    %42 = vector.broadcast %cst_23 : f32 to vector<64x128xf32>
    %43 = arith.mulf %42, %41 : vector<64x128xf32>
    %cst_24 = arith.constant 0.000000e+00 : f32
    %44 = vector.broadcast %cst_24 : f32 to vector<64x128xf32>
    %45 = arith.cmpf ogt, %36, %44 : vector<64x128xf32>
    %46 = arith.select %45, %36, %43 : vector<64x128xi1>, vector<64x128xf32>
    %cst_25 = arith.constant 1.05070102 : f32
    %47 = vector.broadcast %cst_25 : f32 to vector<64x128xf32>
    %48 = arith.mulf %47, %46 : vector<64x128xf32>
    %cst_26 = arith.constant dense<0.000000e+00> : vector<64x128xf32>
    %49 = tpu.matmul %48, %23, %cst_26 {dimension_numbers = #tpu.dot_dimension_numbers<[1], [0], [0], [1], [0, 0, 1, 1], [], []>} : vector<64x128xf32>, vector<128x128xf32>, vector<64x128xf32> -> vector<64x128xf32>
    %50 = vector.broadcast %26 : vector<1x128xf32> to vector<64x128xf32>
    %51 = arith.addf %49, %50 : vector<64x128xf32>
    %cst_27 = arith.constant 0.000000e+00 : f32
    %52 = vector.broadcast %cst_27 : f32 to vector<64x128xf32>
    %53 = arith.minimumf %51, %52 : vector<64x128xf32>
    %54 = math.exp %53 : vector<64x128xf32>
    %cst_28 = arith.constant 1.000000e+00 : f32
    %55 = vector.broadcast %cst_28 : f32 to vector<64x128xf32>
    %56 = arith.subf %54, %55 : vector<64x128xf32>
    %cst_29 = arith.constant 1.67326319 : f32
    %57 = vector.broadcast %cst_29 : f32 to vector<64x128xf32>
    %58 = arith.mulf %57, %56 : vector<64x128xf32>
    %cst_30 = arith.constant 0.000000e+00 : f32
    %59 = vector.broadcast %cst_30 : f32 to vector<64x128xf32>
    %60 = arith.cmpf ogt, %51, %59 : vector<64x128xf32>
    %61 = arith.select %60, %51, %58 : vector<64x128xi1>, vector<64x128xf32>
    %cst_31 = arith.constant 1.05070102 : f32
    %62 = vector.broadcast %cst_31 : f32 to vector<64x128xf32>
    %63 = arith.mulf %62, %61 : vector<64x128xf32>
    %cst_32 = arith.constant dense<0.000000e+00> : vector<64x128xf32>
    %64 = tpu.matmul %63, %24, %cst_32 {dimension_numbers = #tpu.dot_dimension_numbers<[1], [0], [0], [1], [0, 0, 1, 1], [], []>} : vector<64x128xf32>, vector<128x128xf32>, vector<64x128xf32> -> vector<64x128xf32>
    %65 = vector.broadcast %27 : vector<1x128xf32> to vector<64x128xf32>
    %66 = arith.addf %64, %65 : vector<64x128xf32>
    %c0_33 = arith.constant 0 : index
    %c0_34 = arith.constant 0 : index
    %67 = vector.load %arg3[%c0_33, %c0_34] : memref<64x8xf32, #tpu.memory_space<vmem>>, vector<64x8xf32>
    %68 = vector.extract_strided_slice %66 {offsets = [0, 0], sizes = [64, 8], strides = [1, 1]} : vector<64x128xf32> to vector<64x8xf32>
    %69 = arith.subf %67, %68 : vector<64x8xf32>
    %70 = vector.extract_strided_slice %28 {offsets = [0, 0], sizes = [1, 8], strides = [1, 1]} : vector<1x128xf32> to vector<1x8xf32>
    %71 = vector.broadcast %70 : vector<1x8xf32> to vector<64x8xf32>
    %72 = arith.mulf %69, %71 : vector<64x8xf32>
    %73 = arith.mulf %72, %72 : vector<64x8xf32>
    %cst_35 = arith.constant dense<0.000000e+00> : vector<64xf32>
    %74 = vector.multi_reduction <add>, %73, %cst_35 [1] : vector<64x8xf32> to vector<64xf32>
    %75 = vector.shape_cast %74 : vector<64xf32> to vector<64x1xf32>
    %76 = tpu.iota {dimensions = array<i32: 1>} : vector<64x128xi32>
    %77 = vector.shape_cast %75 : vector<64x1xf32> to vector<64x1xf32>
    %78 = vector.broadcast %77 : vector<64x1xf32> to vector<64x128xf32>
    %c9_i32 = arith.constant 9 : i32
    %79 = vector.broadcast %c9_i32 : i32 to vector<64x128xi32>
    %80 = arith.cmpi eq, %76, %79 : vector<64x128xi32>
    %81 = arith.select %80, %78, %66 : vector<64x128xi1>, vector<64x128xf32>
    %c0_36 = arith.constant 0 : index
    %c0_37 = arith.constant 0 : index
    %82 = vector.load %arg6[%c0_36, %c0_37] : memref<64x128xf32, #tpu.memory_space<vmem>>, vector<64x128xf32>
    tpu.vector_store %arg6[%c0_36, %c0_37], %81 {strides = array<i32>} : memref<64x128xf32, #tpu.memory_space<vmem>>, vector<64x128xf32>,
    return
  }
  func.func @transform_0(%arg0: i32) -> (i32, i32) {
    %c0_i32 = arith.constant 0 : i32
    %c0_i32_0 = arith.constant 0 : i32
    return %arg0, %c0_i32 : i32, i32
  }
  func.func @transform_1(%arg0: i32) -> (i32, i32) {
    %c0_i32 = arith.constant 0 : i32
    %c0_i32_0 = arith.constant 0 : i32
    return %arg0, %c0_i32 : i32, i32
  }
  func.func @transform_2(%arg0: i32) -> (i32, i32) {
    %c0_i32 = arith.constant 0 : i32
    %c0_i32_0 = arith.constant 0 : i32
    return %arg0, %c0_i32 : i32, i32
  }
  func.func @transform_3(%arg0: i32) -> (i32, i32) {
    %c0_i32 = arith.constant 0 : i32
    %c0_i32_0 = arith.constant 0 : i32
    %c0_i32_1 = arith.constant 0 : i32
    return %c0_i32, %c0_i32_0 : i32, i32
  }
  func.func @transform_4(%arg0: i32) -> (i32, i32) {
    %c0_i32 = arith.constant 0 : i32
    %c0_i32_0 = arith.constant 0 : i32
    %c0_i32_1 = arith.constant 0 : i32
    return %c0_i32, %c0_i32_0 : i32, i32
  }
  func.func @transform_5(%arg0: i32) -> (i32, i32) {
    %c0_i32 = arith.constant 0 : i32
    %c0_i32_0 = arith.constant 0 : i32
    return %arg0, %c0_i32 : i32, i32
  }
}

module attributes {stable_mosaic.version = 11 : i64} {
  func.func @kernel(%arg0: i32, %arg1: memref<64x48xf32, #tpu.memory_space<vmem>>, %arg2: memref<64x12xf32, #tpu.memory_space<vmem>>, %arg3: memref<64x8xf32, #tpu.memory_space<vmem>>, %arg4: memref<320x128xf32, #tpu.memory_space<vmem>>, %arg5: memref<8x128xf32, #tpu.memory_space<vmem>>, %arg6: memref<64x128xf32, #tpu.memory_space<vmem>>) attributes {dimension_semantics = [#tpu.dimension_semantics<parallel>], iteration_bounds = array<i64: 1>, scalar_prefetch = 0 : i64, scratch_operands = 0 : i64, tpu.core_type = #tpu.core_type<tc>, window_params = [{transform_indices = @transform_0, window_bounds = array<i64: 64, 48>}, {transform_indices = @transform_1, window_bounds = array<i64: 64, 12>}, {transform_indices = @transform_2, window_bounds = array<i64: 64, 8>}, {pipeline_mode = #tpu.pipeline_mode<synchronous>, transform_indices = @transform_3, window_bounds = array<i64: 320, 128>}, {pipeline_mode = #tpu.pipeline_mode<synchronous>, transform_indices = @transform_4, window_bounds = array<i64: 8, 128>}, {transform_indices = @transform_5, window_bounds = array<i64: 64, 128>}]} {
    %c0 = arith.constant 0 : index
    %c0_0 = arith.constant 0 : index
    %0 = vector.load %arg1[%c0, %c0_0] : memref<64x48xf32, #tpu.memory_space<vmem>>, vector<64x48xf32>
    %cst = arith.constant dense<0.000000e+00> : vector<64xf32>
    %1 = vector.multi_reduction <add>, %0, %cst [1] : vector<64x48xf32> to vector<64xf32>
    %2 = vector.shape_cast %1 : vector<64xf32> to vector<64x1xf32>
    %cst_1 = arith.constant 4.800000e+01 : f32
    %3 = vector.broadcast %cst_1 : f32 to vector<64x1xf32>
    %4 = arith.divf %2, %3 : vector<64x1xf32>
    %5 = arith.mulf %0, %0 : vector<64x48xf32>
    %cst_2 = arith.constant dense<0.000000e+00> : vector<64xf32>
    %6 = vector.multi_reduction <add>, %5, %cst_2 [1] : vector<64x48xf32> to vector<64xf32>
    %7 = vector.shape_cast %6 : vector<64xf32> to vector<64x1xf32>
    %cst_3 = arith.constant 4.800000e+01 : f32
    %8 = vector.broadcast %cst_3 : f32 to vector<64x1xf32>
    %9 = arith.divf %7, %8 : vector<64x1xf32>
    %10 = arith.mulf %4, %4 : vector<64x1xf32>
    %11 = arith.subf %9, %10 : vector<64x1xf32>
    %cst_4 = arith.constant 0.000000e+00 : f32
    %12 = vector.broadcast %cst_4 : f32 to vector<64x1xf32>
    %13 = arith.maximumf %11, %12 : vector<64x1xf32>
    %14 = vector.broadcast %4 : vector<64x1xf32> to vector<64x48xf32>
    %15 = arith.subf %0, %14 : vector<64x48xf32>
    %cst_5 = arith.constant 9.99999997E-7 : f32
    %16 = vector.broadcast %cst_5 : f32 to vector<64x1xf32>
    %17 = arith.addf %13, %16 : vector<64x1xf32>
    %18 = math.rsqrt %17 : vector<64x1xf32>
    %19 = vector.broadcast %18 : vector<64x1xf32> to vector<64x48xf32>
    %20 = arith.mulf %15, %19 : vector<64x48xf32>
    %c0_6 = arith.constant 0 : index
    %c0_7 = arith.constant 0 : index
    %21 = vector.load %arg4[%c0_6, %c0_7] : memref<320x128xf32, #tpu.memory_space<vmem>>, vector<48x128xf32>
    %c48 = arith.constant 48 : index
    %c0_8 = arith.constant 0 : index
    %22 = vector.load %arg4[%c48, %c0_8] : memref<320x128xf32, #tpu.memory_space<vmem>>, vector<16x128xf32>
    %c64 = arith.constant 64 : index
    %c0_9 = arith.constant 0 : index
    %23 = vector.load %arg4[%c64, %c0_9] : memref<320x128xf32, #tpu.memory_space<vmem>>, vector<128x128xf32>
    %c192 = arith.constant 192 : index
    %c0_10 = arith.constant 0 : index
    %24 = vector.load %arg4[%c192, %c0_10] : memref<320x128xf32, #tpu.memory_space<vmem>>, vector<128x128xf32>
    %c0_11 = arith.constant 0 : index
    %c0_12 = arith.constant 0 : index
    %25 = vector.load %arg5[%c0_11, %c0_12] : memref<8x128xf32, #tpu.memory_space<vmem>>, vector<1x128xf32>
    %c1 = arith.constant 1 : index
    %c0_13 = arith.constant 0 : index
    %26 = vector.load %arg5[%c1, %c0_13] : memref<8x128xf32, #tpu.memory_space<vmem>>, vector<1x128xf32>
    %c2 = arith.constant 2 : index
    %c0_14 = arith.constant 0 : index
    %27 = vector.load %arg5[%c2, %c0_14] : memref<8x128xf32, #tpu.memory_space<vmem>>, vector<1x128xf32>
    %c3 = arith.constant 3 : index
    %c0_15 = arith.constant 0 : index
    %28 = vector.load %arg5[%c3, %c0_15] : memref<8x128xf32, #tpu.memory_space<vmem>>, vector<1x128xf32>
    %c0_16 = arith.constant 0 : index
    %c0_17 = arith.constant 0 : index
    %29 = vector.load %arg2[%c0_16, %c0_17] : memref<64x12xf32, #tpu.memory_space<vmem>>, vector<64x12xf32>
    %cst_18 = arith.constant 0.000000e+00 : f32
    %30 = vector.broadcast %cst_18 : f32 to vector<64x4xf32>
    %31 = tpu.concatenate %29, %30 in 1 : vector<64x12xf32>, vector<64x4xf32> -> vector<64x16xf32>
    %cst_19 = arith.constant dense<0.000000e+00> : vector<64x128xf32>
    %32 = tpu.matmul %20, %21, %cst_19 {dimension_numbers = #tpu.dot_dimension_numbers<[1], [0], [0], [1], [0, 0, 1, 1], [], []>} : vector<64x48xf32>, vector<48x128xf32>, vector<64x128xf32> -> vector<64x128xf32>
    %cst_20 = arith.constant dense<0.000000e+00> : vector<64x128xf32>
    %33 = tpu.matmul %31, %22, %cst_20 {dimension_numbers = #tpu.dot_dimension_numbers<[1], [0], [0], [1], [0, 0, 1, 1], [], []>} : vector<64x16xf32>, vector<16x128xf32>, vector<64x128xf32> -> vector<64x128xf32>
    %34 = arith.addf %32, %33 : vector<64x128xf32>
    %35 = vector.broadcast %25 : vector<1x128xf32> to vector<64x128xf32>
    %36 = arith.addf %34, %35 : vector<64x128xf32>
    %cst_21 = arith.constant 0.000000e+00 : f32
    %37 = vector.broadcast %cst_21 : f32 to vector<64x128xf32>
    %38 = arith.minimumf %36, %37 : vector<64x128xf32>
    %39 = math.exp %38 : vector<64x128xf32>
    %cst_22 = arith.constant 1.000000e+00 : f32
    %40 = vector.broadcast %cst_22 : f32 to vector<64x128xf32>
    %41 = arith.subf %39, %40 : vector<64x128xf32>
    %cst_23 = arith.constant 1.67326319 : f32
    %42 = vector.broadcast %cst_23 : f32 to vector<64x128xf32>
    %43 = arith.mulf %42, %41 : vector<64x128xf32>
    %cst_24 = arith.constant 0.000000e+00 : f32
    %44 = vector.broadcast %cst_24 : f32 to vector<64x128xf32>
    %45 = arith.cmpf ogt, %36, %44 : vector<64x128xf32>
    %46 = arith.select %45, %36, %43 : vector<64x128xi1>, vector<64x128xf32>
    %cst_25 = arith.constant 1.05070102 : f32
    %47 = vector.broadcast %cst_25 : f32 to vector<64x128xf32>
    %48 = arith.mulf %47, %46 : vector<64x128xf32>
    %cst_26 = arith.constant dense<0.000000e+00> : vector<64x128xf32>
    %49 = tpu.matmul %48, %23, %cst_26 {dimension_numbers = #tpu.dot_dimension_numbers<[1], [0], [0], [1], [0, 0, 1, 1], [], []>} : vector<64x128xf32>, vector<128x128xf32>, vector<64x128xf32> -> vector<64x128xf32>
    %50 = vector.broadcast %26 : vector<1x128xf32> to vector<64x128xf32>
    %51 = arith.addf %49, %50 : vector<64x128xf32>
    %cst_27 = arith.constant 0.000000e+00 : f32
    %52 = vector.broadcast %cst_27 : f32 to vector<64x128xf32>
    %53 = arith.minimumf %51, %52 : vector<64x128xf32>
    %54 = math.exp %53 : vector<64x128xf32>
    %cst_28 = arith.constant 1.000000e+00 : f32
    %55 = vector.broadcast %cst_28 : f32 to vector<64x128xf32>
    %56 = arith.subf %54, %55 : vector<64x128xf32>
    %cst_29 = arith.constant 1.67326319 : f32
    %57 = vector.broadcast %cst_29 : f32 to vector<64x128xf32>
    %58 = arith.mulf %57, %56 : vector<64x128xf32>
    %cst_30 = arith.constant 0.000000e+00 : f32
    %59 = vector.broadcast %cst_30 : f32 to vector<64x128xf32>
    %60 = arith.cmpf ogt, %51, %59 : vector<64x128xf32>
    %61 = arith.select %60, %51, %58 : vector<64x128xi1>, vector<64x128xf32>
    %cst_31 = arith.constant 1.05070102 : f32
    %62 = vector.broadcast %cst_31 : f32 to vector<64x128xf32>
    %63 = arith.mulf %62, %61 : vector<64x128xf32>
    %cst_32 = arith.constant dense<0.000000e+00> : vector<64x128xf32>
    %64 = tpu.matmul %63, %24, %cst_32 {dimension_numbers = #tpu.dot_dimension_numbers<[1], [0], [0], [1], [0, 0, 1, 1], [], []>} : vector<64x128xf32>, vector<128x128xf32>, vector<64x128xf32> -> vector<64x128xf32>
    %65 = vector.broadcast %27 : vector<1x128xf32> to vector<64x128xf32>
    %66 = arith.addf %64, %65 : vector<64x128xf32>
    %c0_33 = arith.constant 0 : index
    %c0_34 = arith.constant 0 : index
    %67 = vector.load %arg3[%c0_33, %c0_34] : memref<64x8xf32, #tpu.memory_space<vmem>>, vector<64x8xf32>
    %68 = vector.extract_strided_slice %66 {offsets = [0, 0], sizes = [64, 8], strides = [1, 1]} : vector<64x128xf32> to vector<64x8xf32>
    %69 = arith.subf %67, %68 : vector<64x8xf32>
    %70 = vector.extract_strided_slice %28 {offsets = [0, 0], sizes = [1, 8], strides = [1, 1]} : vector<1x128xf32> to vector<1x8xf32>
    %71 = vector.broadcast %70 : vector<1x8xf32> to vector<64x8xf32>
    %72 = arith.mulf %69, %71 : vector<64x8xf32>
    %73 = arith.mulf %72, %72 : vector<64x8xf32>
    %cst_35 = arith.constant dense<0.000000e+00> : vector<64xf32>
    %74 = vector.multi_reduction <add>, %73, %cst_35 [1] : vector<64x8xf32> to vector<64xf32>
    %75 = vector.shape_cast %74 : vector<64xf32> to vector<64x1xf32>
    %76 = tpu.iota {dimensions = array<i32: 1>} : vector<64x128xi32>
    %77 = vector.shape_cast %75 : vector<64x1xf32> to vector<64x1xf32>
    %78 = vector.broadcast %77 : vector<64x1xf32> to vector<64x128xf32>
    %c9_i32 = arith.constant 9 : i32
    %79 = vector.broadcast %c9_i32 : i32 to vector<64x128xi32>
    %80 = arith.cmpi eq, %76, %79 : vector<64x128xi32>
    %81 = arith.select %80, %78, %66 : vector<64x128xi1>, vector<64x128xf32>
    %c0_36 = arith.constant 0 : index
    %c0_37 = arith.constant 0 : index
    %82 = vector.load %arg6[%c0_36, %c0_37] : memref<64x128xf32, #tpu.memory_space<vmem>>, vector<64x128xf32>
    tpu.vector_store %arg6[%c0_36, %c0_37], %81 {strides = array<i32>} : memref<64x128xf32, #tpu.memory_space<vmem>>, vector<64x128xf32>,
    return
  }
  func.func @transform_0(%arg0: i32) -> (i32, i32) {
    %c0_i32 = arith.constant 0 : i32
    %c0_i32_0 = arith.constant 0 : i32
    return %arg0, %c0_i32 : i32, i32
  }
  func.func @transform_1(%arg0: i32) -> (i32, i32) {
    %c0_i32 = arith.constant 0 : i32
    %c0_i32_0 = arith.constant 0 : i32
    return %arg0, %c0_i32 : i32, i32
  }
  func.func @transform_2(%arg0: i32) -> (i32, i32) {
    %c0_i32 = arith.constant 0 : i32
    %c0_i32_0 = arith.constant 0 : i32
    return %arg0, %c0_i32 : i32, i32
  }
  func.func @transform_3(%arg0: i32) -> (i32, i32) {
    %c0_i32 = arith.constant 0 : i32
    %c0_i32_0 = arith.constant 0 : i32
    %c0_i32_1 = arith.constant 0 : i32
    return %c0_i32, %c0_i32_0 : i32, i32
  }
  func.func @transform_4(%arg0: i32) -> (i32, i32) {
    %c0_i32 = arith.constant 0 : i32
    %c0_i32_0 = arith.constant 0 : i32
    %c0_i32_1 = arith.constant 0 : i32
    return %c0_i32, %c0_i32_0 : i32, i32
  }
  func.func @transform_5(%arg0: i32) -> (i32, i32) {
    %c0_i32 = arith.constant 0 : i32
    %c0_i32_0 = arith.constant 0 : i32
    return %arg0, %c0_i32 : i32, i32
  }
}

</mosaic_0001>

<bundles_post_ra>
// kernel: tpu_custom_call.1
= control target key start
LH: loop header
LB: loop body
LE: loop exit
PB: predicated region body
PF: predicated region fallthrough
CT: control target
= control target key end

     0   :  { %10 = vsyncpa [#allocation3], 0  ;;  %s1541_s0 = inlined_call_operand.vmem [shape: f32[64,48], index: 0, kind: input, shape index: {}]   ;;  %s1542_s1 = inlined_call_operand.vmem [shape: f32[64,12], index: 1, kind: input, shape index: {}]   ;;  %s1543_s2 = inlined_call_operand.vmem [shape: f32[64,8], index: 2, kind: input, shape index: {}]   ;;  %s1544_s3 = inlined_call_operand.hbm [shape: f32[320,128], index: 3, kind: input, shape index: {}]   ;;  %s1545_s4 = inlined_call_operand.vmem [shape: f32[8,128], index: 4, kind: input, shape index: {}]   ;;  %s1546_s5 = inlined_call_operand.hbm [shape: f32[64,128], index: 5, kind: output, shape index: {}]  }
   0x1   :  { %11 = vsyncpa [#allocation4], 0  ;;  %s1280_s18 = smov [#allocation2]  }
   0x2   :  { %s23_s19 = sshll.u32 %s1280_s18, 4  ;;  %s24_s19 = int_to_ptr.vmem [resolvable:$true] %s23_s19 }
   0x3   :  { %s1244_s20 = scalar_lea.vmem %s24_s19, 5120  ;;  %p1249_p1 = scmp.lt.s32.totalorder %s24_s19, %s24_s19 }
   0x4   :  { %p1245_p0 = scmp.ne.s32.totalorder %s24_s19, %s1244_s20  ;;  %p1250_p2 = scmp.lt.s32.totalorder %s1244_s20, %s1244_s20 }
   0x6   :  { %p1251_p3 = por %p1250_p2, %p1249_p1 }
   0x8   :  { %p1252_p4 = pnand %p1251_p3, %p1245_p0 }
   0xa   :  { %1255 = shalt.err (!%p1252_p4)
}
   0xb   :  { %s1281_s21 = smov 128   ;;  %s1282_s22 = smov 8  }
   0xc   :  { %29 = dma.hbm_to_vmem [thread:$0]  %s1544_s3, 5120, %s24_s19, [#allocation3], %s1281_s21, %s1281_s21, %s1282_s22  }
   0xd   :  { %1276 = dma.done.wait [#allocation3], 5120  }
   0xe   :  { %1277 = vsyncadd [#allocation3], 4294962176  ;;  %vm43_vm0 = vcmask 392192   ;;  %v1323_v0 = vld [vmem:[%s1541_s0 + $0x18] sm:$0xff]  ;;  %v1328_v1 = vld [vmem:[%s1541_s0] sm:$0xff]  ;;  %vm225_vm1 = vcmask 97280  }
   0xf   :  { %v1333_v2 = vld [vmem:[%s1541_s0 + $0x8] sm:$0xff]  ;;  %v53_v3 = vsel %vm43_vm0, %v1323_v0, 0.0  ;;  %v44_v4 = vsel %vm43_vm0, %v1328_v1, 0.0  ;;  %v77_v5 = vmul.f32 %v1328_v1, %v1328_v1  ;;  %v1349_v9 = vld [vmem:[%s1541_s0 + $0x10] sm:$0xff]  ;;  %v80_v12 = vmul.f32 %v1323_v0, %v1323_v0  ;;  %v1368_v17 = vld [vmem:[%s1541_s0 + $0x20] sm:$0xff] }
  0x10   :  { %54 = vadd.xlane.f32.xlu1 %v53_v3  ;;  %45 = vadd.xlane.f32.xlu0 %v44_v4  ;;  %v47_v7 = vsel %vm43_vm0, %v1333_v2, 0.0  ;;  %v78_v8 = vmul.f32 %v1333_v2, %v1333_v2  ;;  %v50_v11 = vsel %vm43_vm0, %v1349_v9, 0.0  ;;  %v79_v13 = vmul.f32 %v1349_v9, %v1349_v9  ;;  %v1363_v16 = vld [vmem:[%s1541_s0 + $0x28] sm:$0xff]  ;;  %v1383_v24 = vld [vmem:[%s1541_s0 + $0x38] sm:$0xff]  ;;  %v1388_v25 = vld [vmem:[%s1541_s0 + $0x30] sm:$0xff] }
  0x11   :  { %v85_v6 = vsel %vm43_vm0, %v77_v5, 0.0  ;;  %v94_v14 = vsel %vm43_vm0, %v80_v12, 0.0  ;;  %v59_v18 = vsel %vm43_vm0, %v1363_v16, 0.0  ;;  %v56_v19 = vsel %vm43_vm0, %v1368_v17, 0.0  ;;  %v178_v32 = vld [vmem:[#allocation2 + $0x28] sm:$0xff]  ;;  %v177_v33 = vld [vmem:[#allocation2 + $0x20] sm:$0xff] }
  0x12   :  { %v88_v10 = vsel %vm43_vm0, %v78_v8, 0.0  ;;  %v91_v15 = vsel %vm43_vm0, %v79_v13, 0.0  ;;  %v82_v20 = vmul.f32 %v1363_v16, %v1363_v16  ;;  %v81_v21 = vmul.f32 %v1368_v17, %v1368_v17  ;;  %1072 = vmatprep.subr.mxu1 %v178_v32  ;;  %v176_v34 = vld [vmem:[#allocation2 + $0x18] sm:$0xff]  ;;  %v175_v35 = vld [vmem:[#allocation2 + $0x10] sm:$0xff]  ;;  %v174_v37 = vld [vmem:[#allocation2 + $0x8] sm:$0xff] }
  0x13   :  { %v65_v26 = vsel %vm43_vm0, %v1383_v24, 0.0  ;;  %v62_v27 = vsel %vm43_vm0, %v1388_v25, 0.0  ;;  %v84_v28 = vmul.f32 %v1383_v24, %v1383_v24  ;;  %v83_v29 = vmul.f32 %v1388_v25, %v1388_v25  ;;  %1073 = vmatpush3.msra.mxu1 %v178_v32  ;;  %v180_v36 = vld [vmem:[#allocation2 + $0x38] sm:$0xff]  ;;  %v179_v38 = vld [vmem:[#allocation2 + $0x30] sm:$0xff]  ;;  %v173_v39 = vld [vmem:[#allocation2] sm:$0xff] }
  0x14   :  { %86 = vadd.xlane.f32.xlu1 %v85_v6  ;;  %48 = vadd.xlane.f32.xlu0 %v47_v7  ;;  %v100_v22 = vsel %vm43_vm0, %v82_v20, 0.0  ;;  %v97_v23 = vsel %vm43_vm0, %v81_v21, 0.0  ;;  %v217_v40 = vld [vmem:[%s1542_s1] sm:$0xff]  ;;  %vm234_vm2 = vcmask 130048   ;;  %v218_v42 = vld [vmem:[%s1542_s1 + $0x8] sm:$0xff]  ;;  %v219_v44 = vld [vmem:[%s1542_s1 + $0x10] sm:$0xff] }
  0x15   :  { %v106_v30 = vsel %vm43_vm0, %v84_v28, 0.0  ;;  %v103_v31 = vsel %vm43_vm0, %v83_v29, 0.0  ;;  %1074 = vmatprep.subr.mxu1 %v177_v33  ;;  %1056 = vmatprep.subr.mxu0 %v180_v36  ;;  %v226_v41 = vsel %vm225_vm1, %v217_v40, 0.0  ;;  %v227_v43 = vsel %vm225_vm1, %v218_v42, 0.0  ;;  %v220_v46 = vld [vmem:[%s1542_s1 + $0x18] sm:$0xff]  ;;  %v221_v48 = vld [vmem:[%s1542_s1 + $0x20] sm:$0xff] }
  0x16   :  { %1075 = vmatpush3.msra.mxu1 %v177_v33  ;;  %1057 = vmatpush3.msra.mxu0 %v180_v36  ;;  %v228_v45 = vsel %vm225_vm1, %v219_v44, 0.0  ;;  %v229_v47 = vsel %vm225_vm1, %v220_v46, 0.0  ;;  %v230_v49 = vsel %vm225_vm1, %v221_v48, 0.0  ;;  %v222_v50 = vld [vmem:[%s1542_s1 + $0x28] sm:$0xff]  ;;  %v223_v52 = vld [vmem:[%s1542_s1 + $0x30] sm:$0xff]  ;;  %v224_v53 = vld [vmem:[%s1542_s1 + $0x38] sm:$0xff] }
  0x17   :  { %1076 = vmatprep.subr.mxu1 %v176_v34  ;;  %1058 = vmatprep.subr.mxu0 %v179_v38  ;;  %v231_v51 = vsel %vm225_vm1, %v222_v50, 0.0  ;;  %v232_v54 = vsel %vm225_vm1, %v223_v52, 0.0  ;;  %v233_v55 = vsel %vm225_vm1, %v224_v53, 0.0 }
  0x18   :  { %89 = vadd.xlane.f32.xlu1 %v88_v10  ;;  %51 = vadd.xlane.f32.xlu0 %v50_v11 }
  0x19   :  { %1077 = vmatpush3.msra.mxu1 %v176_v34  ;;  %1059 = vmatpush3.msra.mxu0 %v179_v38 }
  0x1a   :  { %1078 = vmatprep.subr.mxu1 %v175_v35  ;;  %1060 = vmatprep.mubr.msk.f32.mxu0 %vm234_vm2, %v226_v41 }
  0x1b   :  { %1079 = vmatpush3.msra.mxu1 %v175_v35  ;;  %1061 = vmatmul.mubr.msk.f32.vlgmr.msra.gmra.mxu0 %vm234_vm2, %v227_v43 }
  0x1c   :  { %95 = vadd.xlane.f32.xlu1 %v94_v14  ;;  %92 = vadd.xlane.f32.xlu0 %v91_v15 }
  0x1d   :  { %1080 = vmatprep.subr.mxu1 %v174_v37  ;;  %1063 = vmatprep.mubr.msk.f32.mxu0 %vm234_vm2, %v228_v45 }
  0x1e   :  { %1081 = vmatpush3.msra.mxu1 %v174_v37 }
  0x1f   :  { %1082 = vmatprep.subr.mxu1 %v173_v39  ;;  %1064 = vmatmul.mubr.msk.f32.gmra.mxu0 %vm234_vm2, %v229_v47 }
  0x20   :  { %60 = vadd.xlane.f32.xlu1 %v59_v18  ;;  %57 = vadd.xlane.f32.xlu0 %v56_v19 }
  0x21   :  { %1083 = vmatpush3.msra.mxu1 %v173_v39  ;;  %1066 = vmatprep.mubr.msk.f32.mxu0 %vm234_vm2, %v230_v49 }
  0x23   :  { %1067 = vmatmul.mubr.msk.f32.gmra.mxu0 %vm234_vm2, %v231_v51 }
  0x24   :  { %101 = vadd.xlane.f32.xlu1 %v100_v22  ;;  %98 = vadd.xlane.f32.xlu0 %v97_v23 }
  0x25   :  { %1069 = vmatprep.mubr.msk.f32.mxu0 %vm234_vm2, %v232_v54 }
  0x27   :  { %1070 = vmatmul.mubr.msk.f32.gmra.mxu0 %vm234_vm2, %v233_v55 }
  0x28   :  { %66 = vadd.xlane.f32.xlu1 %v65_v26  ;;  %63 = vadd.xlane.f32.xlu0 %v62_v27 }
  0x2c   :  { %107 = vadd.xlane.f32.xlu1 %v106_v30  ;;  %104 = vadd.xlane.f32.xlu0 %v103_v31 }
  0x99   :  { %v55_v56 = vpop.xlane.xlu1 %54  ;;  %v46_v57 = vpop.xlane.xlu0 %45 }
  0x9a   :  { %v69_v58 = vmul.f32 0.020833334, %v46_v57  ;;  %v1442_v4 = vmul.f32 0.020833334, %v55_v56 }
  0x9c   :  { %v117_v61 = vmul.f32 %v69_v58, %v69_v58  ;;  %v120_v14 = vmul.f32 %v1442_v4, %v1442_v4  ;;  %v141_v51 = vsub.f32 %v1328_v1, %v69_v58  ;;  %v144_v58 = vsub.f32 %v1323_v0, %v1442_v4 }
  0x9d   :  { %v87_v59 = vpop.xlane.xlu1 %86  ;;  %v49_v60 = vpop.xlane.xlu0 %48 }
  0x9e   :  { %v109_v62 = vmul.f32 0.020833334, %v87_v59  ;;  %v1440_v63 = vmul.f32 0.020833334, %v49_v60 }
  0xa0   :  { %v125_v3 = vsub.f32 %v109_v62, %v117_v61  ;;  %v118_v8 = vmul.f32 %v1440_v63, %v1440_v63  ;;  %v142_v55 = vsub.f32 %v1333_v2, %v1440_v63 }
  0xa1   :  { %v90_v5 = vpop.xlane.xlu1 %89  ;;  %v52_v6 = vpop.xlane.xlu0 %51 }
  0xa2   :  { %v133_v7 = vmax.f32 %v125_v3, 0.0  ;;  %v110_v10 = vmul.f32 0.020833334, %v90_v5  ;;  %v1446_v11 = vmul.f32 0.020833334, %v52_v6 }
  0xa4   :  { %v149_v12 = vadd.f32 1e-06, %v133_v7  ;;  %v126_v13 = vsub.f32 %v110_v10, %v118_v8  ;;  %v119_v15 = vmul.f32 %v1446_v11, %v1446_v11  ;;  %v143_v63 = vsub.f32 %v1349_v9, %v1446_v11 }
  0xa5   :  { %v96_v18 = vpop.xlane.xlu1 %95  ;;  %v93_v19 = vpop.xlane.xlu0 %92 }
  0xa6   :  { %1188 = vrsqrt.f32 %v149_v12  ;;  %v134_v20 = vmax.f32 %v126_v13, 0.0  ;;  %v112_v21 = vmul.f32 0.020833334, %v96_v18  ;;  %v111_v22 = vmul.f32 0.020833334, %v93_v19 }
  0xa8   :  { %v150_v23 = vadd.f32 1e-06, %v134_v20  ;;  %v128_v26 = vsub.f32 %v112_v21, %v120_v14  ;;  %v127_v27 = vsub.f32 %v111_v22, %v119_v15 }
  0xa9   :  { %v61_v28 = vpop.xlane.xlu1 %60  ;;  %v58_v29 = vpop.xlane.xlu0 %57 }
  0xaa   :  { %1190 = vrsqrt.f32 %v150_v23  ;;  %v136_v30 = vmax.f32 %v128_v26, 0.0  ;;  %v135_v31 = vmax.f32 %v127_v27, 0.0  ;;  %v74_v32 = vmul.f32 0.020833334, %v61_v28  ;;  %v194_v28 = vld [vmem:[#allocation2 + $0xa8] sm:$0xff] }
  0xab   :  { %v73_v33 = vmul.f32 0.020833334, %v58_v29  ;;  %v191_v29 = vld [vmem:[#allocation2 + $0x90] sm:$0xff] }
  0xac   :  { %v152_v34 = vadd.f32 1e-06, %v136_v30  ;;  %v151_v35 = vadd.f32 1e-06, %v135_v31  ;;  %v122_v36 = vmul.f32 %v74_v32, %v74_v32  ;;  %v146_v0 = vsub.f32 %v1363_v16, %v74_v32  ;;  %v196_v16 = vld [vmem:[#allocation2 + $0xb8] sm:$0xff]  ;;  %v190_v30 = vld [vmem:[#allocation2 + $0x88] sm:$0xff] }
  0xad   :  { %v102_v37 = vpop.xlane.xlu1 %101  ;;  %v99_v38 = vpop.xlane.xlu0 %98  ;;  %v121_v39 = vmul.f32 %v73_v33, %v73_v33  ;;  %v145_v18 = vsub.f32 %v1368_v17, %v73_v33  ;;  %1096 = vmatprep.subr.mxu0 %v196_v16  ;;  %v195_v17 = vld [vmem:[#allocation2 + $0xb0] sm:$0xff]  ;;  %v189_v31 = vld [vmem:[#allocation2 + $0x80] sm:$0xff]  ;;  %v188_v32 = vld [vmem:[#allocation2 + $0x78] sm:$0xff] }
  0xae   :  { %1192 = vrsqrt.f32 %v152_v34  ;;  %v114_v40 = vmul.f32 0.020833334, %v102_v37  ;;  %v113_v41 = vmul.f32 0.020833334, %v99_v38  ;;  %1097 = vmatpush3.msra.mxu0 %v196_v16  ;;  %v187_v33 = vld [vmem:[#allocation2 + $0x70] sm:$0xff]  ;;  %v186_v34 = vld [vmem:[#allocation2 + $0x68] sm:$0xff] }
  0xaf   :  { %1194 = vrsqrt.f32 %v151_v35  ;;  %1098 = vmatprep.subr.mxu0 %v195_v17  ;;  %v185_v35 = vld [vmem:[#allocation2 + $0x60] sm:$0xff]  ;;  %v183_v37 = vld [vmem:[#allocation2 + $0x50] sm:$0xff]  ;;  %v182_v38 = vld [vmem:[#allocation2 + $0x48] sm:$0xff] }
  0xb0   :  { %v130_v42 = vsub.f32 %v114_v40, %v122_v36  ;;  %v129_v43 = vsub.f32 %v113_v41, %v121_v39  ;;  %1099 = vmatpush3.msra.mxu0 %v195_v17  ;;  %v184_v36 = vld [vmem:[#allocation2 + $0x58] sm:$0xff]  ;;  %v181_v39 = vld [vmem:[#allocation2 + $0x40] sm:$0xff] }
  0xb1   :  { %v67_v44 = vpop.xlane.xlu1 %66  ;;  %v64_v45 = vpop.xlane.xlu0 %63  ;;  %1100 = vmatprep.subr.mxu0 %v194_v28  ;;  %v212_v40 = vld [vmem:[#allocation2 + $0x138] sm:$0xff] }
  0xb2   :  { %v138_v46 = vmax.f32 %v130_v42, 0.0  ;;  %v137_v47 = vmax.f32 %v129_v43, 0.0  ;;  %v76_v48 = vmul.f32 0.020833334, %v67_v44  ;;  %v75_v49 = vmul.f32 0.020833334, %v64_v45  ;;  %1101 = vmatpush3.msra.mxu0 %v194_v28  ;;  %1140 = vmatprep.subr.mxu1 %v212_v40 }
  0xb3   :  { %v1189_v50 = vpop.eup %1188  ;;  %v964_v43 = vld [vmem:[%s1545_s4] ss:$0 sm:$0xff] }
  0xb4   :  { %v154_v52 = vadd.f32 1e-06, %v138_v46  ;;  %v153_v53 = vadd.f32 1e-06, %v137_v47  ;;  %v124_v54 = vmul.f32 %v76_v48, %v76_v48  ;;  %v165_v59 = vmul.f32 %v1189_v50, %v141_v51 }
  0xb5   :  { %v108_v56 = vpop.xlane.xlu1 %107  ;;  %v105_v57 = vpop.xlane.xlu0 %104  ;;  %v123_v60 = vmul.f32 %v75_v49, %v75_v49  ;;  %v148_v9 = vsub.f32 %v1383_v24, %v76_v48  ;;  %v147_v22 = vsub.f32 %v1388_v25, %v75_v49  ;;  %v193_v24 = vld [vmem:[#allocation2 + $0xa0] sm:$0xff]  ;;  %v192_v25 = vld [vmem:[#allocation2 + $0x98] sm:$0xff] }
  0xb6   :  { %1196 = vrsqrt.f32 %v154_v52  ;;  %v116_v61 = vmul.f32 0.020833334, %v108_v56  ;;  %v115_v62 = vmul.f32 0.020833334, %v105_v57  ;;  %1084 = vmatprep.mubr.msk.f32.mxu1 %vm43_vm0, %v165_v59  ;;  %1102 = vmatprep.subr.mxu0 %v193_v24 }
  0xb7   :  { %v1191_v3 = vpop.eup %1190  ;;  %1198 = vrsqrt.f32 %v153_v53  ;;  %1103 = vmatpush3.msra.mxu0 %v193_v24 }
  0xb8   :  { %v132_v5 = vsub.f32 %v116_v61, %v124_v54  ;;  %v131_v6 = vsub.f32 %v115_v62, %v123_v60  ;;  %v166_v1 = vmul.f32 %v1191_v3, %v142_v55  ;;  %1104 = vmatprep.subr.mxu0 %v192_v25 }
  0xb9   :  { %1105 = vmatpush3.msra.mxu0 %v192_v25 }
  0xba   :  { %v140_v7 = vmax.f32 %v132_v5, 0.0  ;;  %v139_v8 = vmax.f32 %v131_v6, 0.0  ;;  %1085 = vmatmul.mubr.msk.f32.vlgmr.msra.gmra.mxu1 %vm43_vm0, %v166_v1  ;;  %1106 = vmatprep.subr.mxu0 %v191_v29 }
  0xbb   :  { %v1193_v2 = vpop.eup %1192  ;;  %1107 = vmatpush3.msra.mxu0 %v191_v29  ;;  %1141 = vmatpush3.msra.mxu1 %v212_v40 }
  0xbc   :  { %v1195_v10 = vpop.eup %1194  ;;  %v156_v12 = vadd.f32 1e-06, %v140_v7  ;;  %v155_v13 = vadd.f32 1e-06, %v139_v8  ;;  %v168_v14 = vmul.f32 %v1193_v2, %v144_v58  ;;  %1108 = vmatprep.subr.mxu0 %v190_v30 }
  0xbd   :  { %v167_v15 = vmul.f32 %v1195_v10, %v143_v63  ;;  %1109 = vmatpush3.msra.mxu0 %v190_v30 }
  0xbe   :  { %1200 = vrsqrt.f32 %v156_v12  ;;  %1110 = vmatprep.subr.mxu0 %v189_v31 }
  0xbf   :  { %1202 = vrsqrt.f32 %v155_v13  ;;  %1087 = vmatprep.mubr.msk.f32.mxu1 %vm43_vm0, %v167_v15  ;;  %1111 = vmatpush3.msra.mxu0 %v189_v31 }
  0xc0   :  { %1088 = vmatmul.mubr.msk.f32.gmra.mxu1 %vm43_vm0, %v168_v14  ;;  %1112 = vmatprep.subr.mxu0 %v188_v32 }
  0xc1   :  { %1113 = vmatpush3.msra.mxu0 %v188_v32 }
  0xc2   :  { %1114 = vmatprep.subr.mxu0 %v187_v33 }
  0xc3   :  { %v1197_v4 = vpop.eup %1196  ;;  %1115 = vmatpush3.msra.mxu0 %v187_v33 }
  0xc4   :  { %v1199_v19 = vpop.eup %1198  ;;  %v170_v20 = vmul.f32 %v1197_v4, %v146_v0  ;;  %1116 = vmatprep.subr.mxu0 %v186_v34 }
  0xc5   :  { %v169_v21 = vmul.f32 %v1199_v19, %v145_v18  ;;  %1117 = vmatpush3.msra.mxu0 %v186_v34 }
  0xc6   :  { %1118 = vmatprep.subr.mxu0 %v185_v35 }
  0xc7   :  { %1090 = vmatprep.mubr.msk.f32.mxu1 %vm43_vm0, %v169_v21  ;;  %1119 = vmatpush3.msra.mxu0 %v185_v35 }
  0xc8   :  { %1091 = vmatmul.mubr.msk.f32.gmra.mxu1 %vm43_vm0, %v170_v20  ;;  %1120 = vmatprep.subr.mxu0 %v184_v36 }
  0xc9   :  { %1121 = vmatpush3.msra.mxu0 %v184_v36 }
  0xca   :  { %1122 = vmatprep.subr.mxu0 %v183_v37 }
  0xcb   :  { %v1201_v11 = vpop.eup %1200  ;;  %1123 = vmatpush3.msra.mxu0 %v183_v37 }
  0xcc   :  { %v1203_v23 = vpop.eup %1202  ;;  %v172_v26 = vmul.f32 %v1201_v11, %v148_v9  ;;  %1124 = vmatprep.subr.mxu0 %v182_v38 }
  0xcd   :  { %v171_v27 = vmul.f32 %v1203_v23, %v147_v22  ;;  %1125 = vmatpush3.msra.mxu0 %v182_v38 }
  0xce   :  { %1126 = vmatprep.subr.mxu0 %v181_v39 }
  0xcf   :  { %1093 = vmatprep.mubr.msk.f32.mxu1 %vm43_vm0, %v171_v27  ;;  %1127 = vmatpush3.msra.mxu0 %v181_v39 }
  0xd0   :  { %1094 = vmatmul.mubr.msk.f32.gmra.mxu1 %vm43_vm0, %v172_v26 }
  0xdb   :  { %v1062_v41 = vpop.f32.mrf.mxu0 }
  0xdd   :  { %v325_v42 = vpop.f32.mrf.mxu0 }
  0xdf   :  { %v1065_v47 = vpop.f32.mrf.mxu0 }
  0xe1   :  { %v335_v53 = vpop.f32.mrf.mxu0 }
  0xe3   :  { %v1068_v62 = vpop.f32.mrf.mxu0 }
  0xe5   :  { %v345_v7 = vpop.f32.mrf.mxu0 }
  0xe7   :  { %v1071_v15 = vpop.f32.mrf.mxu0 }
  0xe9   :  { %v355_v22 = vpop.f32.mrf.mxu0 }
 0x17a   :  { %v1086_v44 = vpop.f32.mrf.mxu1 }
 0x17b   :  { %v460_v45 = vadd.f32 %v1086_v44, %v1062_v41 }
 0x17c   :  { %v454_v46 = vpop.f32.mrf.mxu1 }
 0x17d   :  { %v498_v48 = vadd.f32 %v964_v43, %v460_v45  ;;  %v455_v49 = vadd.f32 %v454_v46, %v325_v42 }
 0x17f   :  { %v506_v50 = vmin.f32 %v498_v48, 0.0  ;;  %v497_v51 = vadd.f32 %v964_v43, %v455_v49  ;;  %vm546_vm3 = vcmp.gt.f32.partialorder %v498_v48, 0.0 }
 0x180   :  { %v1089_v52 = vpop.f32.mrf.mxu1 }
 0x181   :  { %v515_v54 = vmul.f32 1.442695, %v506_v50  ;;  %v505_v55 = vmin.f32 %v497_v51, 0.0  ;;  %v470_v56 = vadd.f32 %v1089_v52, %v1065_v47  ;;  %vm545_vm4 = vcmp.gt.f32.partialorder %v497_v51, 0.0 }
 0x182   :  { %v464_v57 = vpop.f32.mrf.mxu1 }
 0x183   :  { %1204 = vpow2.f32 %v515_v54  ;;  %v513_v59 = vmul.f32 1.442695, %v505_v55  ;;  %v500_v60 = vadd.f32 %v964_v43, %v470_v56  ;;  %v465_v61 = vadd.f32 %v464_v57, %v335_v53 }
 0x185   :  { %1206 = vpow2.f32 %v513_v59  ;;  %v508_v3 = vmin.f32 %v500_v60, 0.0  ;;  %v499_v5 = vadd.f32 %v964_v43, %v465_v61  ;;  %vm548_vm5 = vcmp.gt.f32.partialorder %v500_v60, 0.0 }
 0x187   :  { %v519_v6 = vmul.f32 1.442695, %v508_v3  ;;  %v507_v1 = vmin.f32 %v499_v5, 0.0  ;;  %vm547_vm6 = vcmp.gt.f32.partialorder %v499_v5, 0.0 }
 0x188   :  { %v1092_v58 = vpop.f32.mrf.mxu1 }
 0x189   :  { %1208 = vpow2.f32 %v519_v6  ;;  %v517_v8 = vmul.f32 1.442695, %v507_v1  ;;  %v480_v2 = vadd.f32 %v1092_v58, %v1068_v62  ;;  %v211_v58 = vld [vmem:[#allocation2 + $0x130] sm:$0xff] }
 0x18a   :  { %v474_v63 = vpop.f32.mrf.mxu1  ;;  %1142 = vmatprep.subr.mxu1 %v211_v58 }
 0x18b   :  { %1210 = vpow2.f32 %v517_v8  ;;  %v502_v10 = vadd.f32 %v964_v43, %v480_v2  ;;  %v475_v12 = vadd.f32 %v474_v63, %v345_v7  ;;  %1143 = vmatpush3.msra.mxu1 %v211_v58  ;;  %v210_v7 = vld [vmem:[#allocation2 + $0x128] sm:$0xff]  ;;  %v209_v8 = vld [vmem:[#allocation2 + $0x120] sm:$0xff]  ;;  %v208_v2 = vld [vmem:[#allocation2 + $0x118] sm:$0xff] }
 0x18c   :  { %1144 = vmatprep.subr.mxu1 %v210_v7  ;;  %v207_v63 = vld [vmem:[#allocation2 + $0x110] sm:$0xff] }
 0x18d   :  { %v510_v13 = vmin.f32 %v502_v10, 0.0  ;;  %v501_v14 = vadd.f32 %v964_v43, %v475_v12  ;;  %vm550_vm7 = vcmp.gt.f32.partialorder %v502_v10, 0.0  ;;  %1145 = vmatpush3.msra.mxu1 %v210_v7  ;;  %v205_v12 = vld [vmem:[#allocation2 + $0x100] sm:$0xff] }
 0x18e   :  { %1146 = vmatprep.subr.mxu1 %v209_v8 }
 0x18f   :  { %v523_v0 = vmul.f32 1.442695, %v510_v13  ;;  %v509_v4 = vmin.f32 %v501_v14, 0.0  ;;  %vm549_vm8 = vcmp.gt.f32.partialorder %v501_v14, 0.0  ;;  %1147 = vmatpush3.msra.mxu1 %v209_v8  ;;  %v204_v13 = vld [vmem:[#allocation2 + $0xf8] sm:$0xff] }
 0x190   :  { %v1205_v18 = vpop.eup %1204  ;;  %v1095_v19 = vpop.f32.mrf.mxu1  ;;  %1148 = vmatprep.subr.mxu1 %v208_v2 }
 0x191   :  { %v966_v20 = vadd.f32 -1.0, %v1205_v18  ;;  %1212 = vpow2.f32 %v523_v0  ;;  %v521_v21 = vmul.f32 1.442695, %v509_v4  ;;  %v490_v9 = vadd.f32 %v1095_v19, %v1071_v15  ;;  %1149 = vmatpush3.msra.mxu1 %v208_v2  ;;  %v202_v15 = vld [vmem:[#allocation2 + $0xe8] sm:$0xff]  ;;  %v201_v0 = vld [vmem:[#allocation2 + $0xe0] sm:$0xff]  ;;  %v200_v4 = vld [vmem:[#allocation2 + $0xd8] sm:$0xff] }
 0x192   :  { %v1207_v11 = vpop.eup %1206  ;;  %v484_v23 = vpop.f32.mrf.mxu1  ;;  %1150 = vmatprep.subr.mxu1 %v207_v63  ;;  %v199_v18 = vld [vmem:[#allocation2 + $0xd0] sm:$0xff]  ;;  %v198_v19 = vld [vmem:[#allocation2 + $0xc8] sm:$0xff] }
 0x193   :  { %v538_v26 = vmul.f32 1.6732632, %v966_v20  ;;  %1214 = vpow2.f32 %v521_v21  ;;  %v504_v27 = vadd.f32 %v964_v43, %v490_v9  ;;  %v485_v16 = vadd.f32 %v484_v23, %v355_v22  ;;  %1151 = vmatpush3.msra.mxu1 %v207_v63  ;;  %v197_v20 = vld [vmem:[#allocation2 + $0xc0] sm:$0xff] }
 0x194   :  { %v965_v17 = vadd.f32 -1.0, %v1207_v11  ;;  %v973_v21 = vld [vmem:[%s1545_s4 + $0x1] ss:$0 sm:$0xff] }
 0x195   :  { %v512_v28 = vmin.f32 %v504_v27, 0.0  ;;  %v503_v24 = vadd.f32 %v964_v43, %v485_v16  ;;  %v554_v30 = vsel %vm546_vm3, %v498_v48, %v538_v26  ;;  %vm552_vm9 = vcmp.gt.f32.partialorder %v504_v27, 0.0 }
 0x196   :  { %v1209_v25 = vpop.eup %1208  ;;  %v537_v29 = vmul.f32 1.6732632, %v965_v17  ;;  %v562_v39 = vmul.f32 1.050701, %v554_v30  ;;  %vm887_vm3 = vcmask 64512  }
 0x197   :  { %v527_v31 = vmul.f32 1.442695, %v512_v28  ;;  %v511_v32 = vmin.f32 %v503_v24, 0.0  ;;  %v968_v33 = vadd.f32 -1.0, %v1209_v25  ;;  %vm551_vm10 = vcmp.gt.f32.partialorder %v503_v24, 0.0 }
 0x198   :  { %v1211_v34 = vpop.eup %1210  ;;  %v553_v35 = vsel %vm545_vm4, %v497_v51, %v537_v29 }
 0x199   :  { %1216 = vpow2.f32 %v527_v31  ;;  %v525_v36 = vmul.f32 1.442695, %v511_v32  ;;  %v561_v37 = vmul.f32 1.050701, %v553_v35  ;;  %v967_v38 = vadd.f32 -1.0, %v1211_v34 }
 0x19a   :  { %v540_v40 = vmul.f32 1.6732632, %v968_v33 }
 0x19b   :  { %1218 = vpow2.f32 %v525_v36  ;;  %1128 = vmatprep.mubr.f32.mxu0 %v561_v37  ;;  %v539_v41 = vmul.f32 1.6732632, %v967_v38 }
 0x19c   :  { %1129 = vmatmul.mubr.f32.vlgmr.msra.gmra.mxu0 %v562_v39  ;;  %v556_v42 = vsel %vm548_vm5, %v500_v60, %v540_v40 }
 0x19d   :  { %v555_v43 = vsel %vm547_vm6, %v499_v5, %v539_v41  ;;  %v564_v46 = vmul.f32 1.050701, %v556_v42 }
 0x19e   :  { %v1213_v44 = vpop.eup %1212  ;;  %v563_v45 = vmul.f32 1.050701, %v555_v43 }
 0x19f   :  { %v970_v47 = vadd.f32 -1.0, %v1213_v44 }
 0x1a0   :  { %v1215_v48 = vpop.eup %1214  ;;  %1131 = vmatprep.mubr.f32.mxu0 %v563_v45 }
 0x1a1   :  { %1132 = vmatmul.mubr.f32.gmra.mxu0 %v564_v46  ;;  %v969_v49 = vadd.f32 -1.0, %v1215_v48  ;;  %v542_v50 = vmul.f32 1.6732632, %v970_v47 }
 0x1a3   :  { %v541_v51 = vmul.f32 1.6732632, %v969_v49  ;;  %v558_v52 = vsel %vm550_vm7, %v502_v10, %v542_v50  ;;  %v206_v10 = vld [vmem:[#allocation2 + $0x108] sm:$0xff] }
 0x1a4   :  { %v566_v56 = vmul.f32 1.050701, %v558_v52  ;;  %1152 = vmatprep.subr.mxu1 %v206_v10 }
 0x1a5   :  { %v557_v53 = vsel %vm549_vm8, %v501_v14, %v541_v51  ;;  %1153 = vmatpush3.msra.mxu1 %v206_v10  ;;  %v203_v14 = vld [vmem:[#allocation2 + $0xf0] sm:$0xff] }
 0x1a6   :  { %v1217_v54 = vpop.eup %1216  ;;  %v565_v55 = vmul.f32 1.050701, %v557_v53  ;;  %1154 = vmatprep.subr.mxu1 %v205_v12 }
 0x1a7   :  { %v972_v57 = vadd.f32 -1.0, %v1217_v54  ;;  %1155 = vmatpush3.msra.mxu1 %v205_v12 }
 0x1a8   :  { %v1219_v59 = vpop.eup %1218  ;;  %1134 = vmatprep.mubr.f32.mxu0 %v565_v55  ;;  %1156 = vmatprep.subr.mxu1 %v204_v13 }
 0x1a9   :  { %1135 = vmatmul.mubr.f32.gmra.mxu0 %v566_v56  ;;  %v971_v60 = vadd.f32 -1.0, %v1219_v59  ;;  %v544_v61 = vmul.f32 1.6732632, %v972_v57  ;;  %1157 = vmatpush3.msra.mxu1 %v204_v13 }
 0x1aa   :  { %1158 = vmatprep.subr.mxu1 %v203_v14 }
 0x1ab   :  { %v543_v62 = vmul.f32 1.6732632, %v971_v60  ;;  %v560_v3 = vsel %vm552_vm9, %v504_v27, %v544_v61  ;;  %1159 = vmatpush3.msra.mxu1 %v203_v14 }
 0x1ac   :  { %v568_v1 = vmul.f32 1.050701, %v560_v3  ;;  %1160 = vmatprep.subr.mxu1 %v202_v15 }
 0x1ad   :  { %v559_v5 = vsel %vm551_vm10, %v503_v24, %v543_v62  ;;  %1161 = vmatpush3.msra.mxu1 %v202_v15 }
 0x1ae   :  { %v567_v6 = vmul.f32 1.050701, %v559_v5  ;;  %1162 = vmatprep.subr.mxu1 %v201_v0 }
 0x1af   :  { %1163 = vmatpush3.msra.mxu1 %v201_v0 }
 0x1b0   :  { %1137 = vmatprep.mubr.f32.mxu0 %v567_v6  ;;  %1164 = vmatprep.subr.mxu1 %v200_v4 }
 0x1b1   :  { %1138 = vmatmul.mubr.f32.gmra.mxu0 %v568_v1  ;;  %1165 = vmatpush3.msra.mxu1 %v200_v4 }
 0x1b2   :  { %1166 = vmatprep.subr.mxu1 %v199_v18 }
 0x1b3   :  { %1167 = vmatpush3.msra.mxu1 %v199_v18 }
 0x1b4   :  { %1168 = vmatprep.subr.mxu1 %v198_v19 }
 0x1b5   :  { %1169 = vmatpush3.msra.mxu1 %v198_v19 }
 0x1b6   :  { %1170 = vmatprep.subr.mxu1 %v197_v20 }
 0x1b7   :  { %1171 = vmatpush3.msra.mxu1 %v197_v20 }
 0x25c   :  { %v1130_v9 = vpop.f32.mrf.mxu0 }
 0x25d   :  { %v645_v11 = vadd.f32 %v1130_v9, %v973_v21 }
 0x25e   :  { %v639_v22 = vpop.f32.mrf.mxu0 }
 0x25f   :  { %v679_v23 = vmin.f32 %v645_v11, 0.0  ;;  %v640_v26 = vadd.f32 %v973_v21, %v639_v22  ;;  %vm719_vm11 = vcmp.gt.f32.partialorder %v645_v11, 0.0 }
 0x261   :  { %v688_v27 = vmul.f32 1.442695, %v679_v23  ;;  %v678_v16 = vmin.f32 %v640_v26, 0.0  ;;  %v1133_v17 = vpop.f32.mrf.mxu0  ;;  %vm718_vm12 = vcmp.gt.f32.partialorder %v640_v26, 0.0 }
 0x262   :  { %v655_v28 = vadd.f32 %v1133_v17, %v973_v21 }
 0x263   :  { %1220 = vpow2.f32 %v688_v27  ;;  %v686_v24 = vmul.f32 1.442695, %v678_v16  ;;  %v649_v25 = vpop.f32.mrf.mxu0 }
 0x264   :  { %v681_v29 = vmin.f32 %v655_v28, 0.0  ;;  %v650_v30 = vadd.f32 %v973_v21, %v649_v25  ;;  %vm721_vm13 = vcmp.gt.f32.partialorder %v655_v28, 0.0  ;;  %v852_v25 = vld [vmem:[%s1543_s2 + $0x8] sm:$0xff] }
 0x265   :  { %1222 = vpow2.f32 %v686_v24 }
 0x266   :  { %v692_v31 = vmul.f32 1.442695, %v681_v29  ;;  %v680_v32 = vmin.f32 %v650_v30, 0.0  ;;  %vm720_vm14 = vcmp.gt.f32.partialorder %v650_v30, 0.0 }
 0x268   :  { %1224 = vpow2.f32 %v692_v31  ;;  %v690_v33 = vmul.f32 1.442695, %v680_v32  ;;  %v851_v31 = vld [vmem:[%s1543_s2] sm:$0xff] }
 0x269   :  { %v1136_v34 = vpop.f32.mrf.mxu0  ;;  %v983_v32 = vld [vmem:[%s1545_s4 + $0x3] ss:$0 sm:$0xff] }
 0x26a   :  { %1226 = vpow2.f32 %v690_v33  ;;  %v665_v35 = vadd.f32 %v1136_v34, %v973_v21 }
 0x26b   :  { %v659_v36 = vpop.f32.mrf.mxu0 }
 0x26c   :  { %v683_v37 = vmin.f32 %v665_v35, 0.0  ;;  %v660_v38 = vadd.f32 %v973_v21, %v659_v36  ;;  %vm723_vm15 = vcmp.gt.f32.partialorder %v665_v35, 0.0 }
 0x26e   :  { %v696_v39 = vmul.f32 1.442695, %v683_v37  ;;  %v682_v40 = vmin.f32 %v660_v38, 0.0  ;;  %vm722_vm0 = vcmp.gt.f32.partialorder %v660_v38, 0.0  ;;  %v854_v37 = vld [vmem:[%s1543_s2 + $0x18] sm:$0xff] }
 0x270   :  { %v1221_v41 = vpop.eup %1220  ;;  %1228 = vpow2.f32 %v696_v39  ;;  %v694_v42 = vmul.f32 1.442695, %v682_v40 }
 0x271   :  { %v975_v43 = vadd.f32 -1.0, %v1221_v41  ;;  %v1139_v44 = vpop.f32.mrf.mxu0  ;;  %v853_v41 = vld [vmem:[%s1543_s2 + $0x10] sm:$0xff] }
 0x272   :  { %v1223_v45 = vpop.eup %1222  ;;  %1230 = vpow2.f32 %v694_v42  ;;  %v675_v46 = vadd.f32 %v1139_v44, %v973_v21 }
 0x273   :  { %v711_v47 = vmul.f32 1.6732632, %v975_v43  ;;  %v669_v48 = vpop.f32.mrf.mxu0  ;;  %v974_v49 = vadd.f32 -1.0, %v1223_v45 }
 0x274   :  { %v685_v50 = vmin.f32 %v675_v46, 0.0  ;;  %v670_v51 = vadd.f32 %v973_v21, %v669_v48  ;;  %vm725_vm1 = vcmp.gt.f32.partialorder %v675_v46, 0.0 }
 0x275   :  { %v1225_v52 = vpop.eup %1224  ;;  %v710_v53 = vmul.f32 1.6732632, %v974_v49  ;;  %v727_v54 = vsel %vm719_vm11, %v645_v11, %v711_v47 }
 0x276   :  { %v700_v55 = vmul.f32 1.442695, %v685_v50  ;;  %v684_v56 = vmin.f32 %v670_v51, 0.0  ;;  %v977_v60 = vadd.f32 -1.0, %v1225_v52  ;;  %v735_v5 = vmul.f32 1.050701, %v727_v54 }
 0x277   :  { %v1227_v57 = vpop.eup %1226  ;;  %v726_v59 = vsel %vm718_vm12, %v640_v26, %v710_v53  ;;  %vm724_vm2 = vcmp.gt.f32.partialorder %v670_v51, 0.0  ;;  %v856_v54 = vld [vmem:[%s1543_s2 + $0x28] sm:$0xff] }
 0x278   :  { %1232 = vpow2.f32 %v700_v55  ;;  %v698_v61 = vmul.f32 1.442695, %v684_v56  ;;  %v734_v62 = vmul.f32 1.050701, %v726_v59  ;;  %v976_v3 = vadd.f32 -1.0, %v1227_v57 }
 0x279   :  { %v713_v6 = vmul.f32 1.6732632, %v977_v60  ;;  %v855_v60 = vld [vmem:[%s1543_s2 + $0x20] sm:$0xff] }
 0x27a   :  { %1234 = vpow2.f32 %v698_v61  ;;  %1172 = vmatprep.mubr.f32.mxu1 %v734_v62  ;;  %v712_v1 = vmul.f32 1.6732632, %v976_v3 }
 0x27b   :  { %1173 = vmatmul.mubr.f32.vlgmr.msra.gmra.mxu1 %v735_v5  ;;  %v729_v58 = vsel %vm721_vm13, %v655_v28, %v713_v6  ;;  %v982_v28 = vld [vmem:[%s1545_s4 + $0x2] ss:$0 sm:$0xff] }
 0x27c   :  { %v728_v7 = vsel %vm720_vm14, %v650_v30, %v712_v1  ;;  %v737_v63 = vmul.f32 1.050701, %v729_v58 }
 0x27d   :  { %v1229_v8 = vpop.eup %1228  ;;  %v736_v2 = vmul.f32 1.050701, %v728_v7 }
 0x27e   :  { %v979_v10 = vadd.f32 -1.0, %v1229_v8  ;;  %v858_v8 = vld [vmem:[%s1543_s2 + $0x38] sm:$0xff] }
 0x27f   :  { %v1231_v12 = vpop.eup %1230  ;;  %1175 = vmatprep.mubr.f32.mxu1 %v736_v2 }
 0x280   :  { %1176 = vmatmul.mubr.f32.gmra.mxu1 %v737_v63  ;;  %v978_v13 = vadd.f32 -1.0, %v1231_v12  ;;  %v715_v14 = vmul.f32 1.6732632, %v979_v10 }
 0x282   :  { %v714_v15 = vmul.f32 1.6732632, %v978_v13  ;;  %v731_v0 = vsel %vm723_vm15, %v665_v35, %v715_v14  ;;  %v857_v13 = vld [vmem:[%s1543_s2 + $0x30] sm:$0xff]  ;;  %s1283_s2 = smov [#allocation5]  }
 0x283   :  { %v739_v20 = vmul.f32 1.050701, %v731_v0  ;;  %s936_s29 = sshll.u32 %s1283_s2, 4  ;;  %s937_s29 = int_to_ptr.vmem [resolvable:$true] %s936_s29 }
 0x284   :  { %v730_v4 = vsel %vm722_vm0, %v660_v38, %v714_v15  ;;  %s1256_s30 = scalar_lea.vmem %s937_s29, 1024  ;;  %p1261_p6 = scmp.lt.s32.totalorder %s937_s29, %s937_s29 }
 0x285   :  { %v1233_v18 = vpop.eup %1232  ;;  %v738_v19 = vmul.f32 1.050701, %v730_v4  ;;  %p1257_p5 = scmp.ne.s32.totalorder %s937_s29, %s1256_s30  ;;  %p1262_p7 = scmp.lt.s32.totalorder %s1256_s30, %s1256_s30 }
 0x286   :  { %v981_v21 = vadd.f32 -1.0, %v1233_v18 }
 0x287   :  { %v1235_v9 = vpop.eup %1234  ;;  %1178 = vmatprep.mubr.f32.mxu1 %v738_v19  ;;  %p1263_p8 = por %p1262_p7, %p1261_p6 }
 0x288   :  { %1179 = vmatmul.mubr.f32.gmra.mxu1 %v739_v20  ;;  %v980_v11 = vadd.f32 -1.0, %v1235_v9  ;;  %v717_v22 = vmul.f32 1.6732632, %v981_v21 }
 0x289   :  { %p1264_p9 = pnand %p1263_p8, %p1257_p5 }
 0x28a   :  { %v716_v23 = vmul.f32 1.6732632, %v980_v11  ;;  %v733_v26 = vsel %vm725_vm1, %v675_v46, %v717_v22  ;;  %v912_v22 = vlaneseq }
 0x28b   :  { %v741_v17 = vmul.f32 1.050701, %v733_v26 }
 0x28c   :  { %v732_v27 = vsel %vm724_vm2, %v670_v51, %v716_v23  ;;  %v913_v23 = vand.u32 127, %v912_v22 }
 0x28d   :  { %v740_v16 = vmul.f32 1.050701, %v732_v27 }
 0x28e   :  { %vm914_vm4 = vcmp.eq.s32.totalorder %v913_v23, 9 }
 0x28f   :  { %1181 = vmatprep.mubr.f32.mxu1 %v740_v16 }
 0x290   :  { %1182 = vmatmul.mubr.f32.gmra.mxu1 %v741_v17 }
 0x33b   :  { %v1174_v24 = vpop.f32.mrf.mxu1 }
 0x33c   :  { %v1483_v29 = vadd.f32 %v1174_v24, %v982_v28 }
 0x33d   :  { %v812_v30 = vpop.f32.mrf.mxu1 }
 0x33e   :  { %v860_v33 = vsub.f32 %v852_v25, %v1483_v29  ;;  %v1492_v34 = vadd.f32 %v982_v28, %v812_v30 }
 0x340   :  { %v859_v35 = vsub.f32 %v851_v31, %v1492_v34  ;;  %v1177_v36 = vpop.f32.mrf.mxu1  ;;  %v872_v38 = vmul.f32 %v983_v32, %v860_v33 }
 0x341   :  { %v1498_v39 = vadd.f32 %v1177_v36, %v982_v28 }
 0x342   :  { %v822_v40 = vpop.f32.mrf.mxu1  ;;  %v880_v42 = vmul.f32 %v872_v38, %v872_v38  ;;  %v871_v43 = vmul.f32 %v983_v32, %v859_v35 }
 0x343   :  { %v862_v44 = vsub.f32 %v854_v37, %v1498_v39  ;;  %v823_v45 = vadd.f32 %v982_v28, %v822_v40 }
 0x344   :  { %v891_v46 = vsel %vm887_vm3, %v880_v42, 0.0  ;;  %v879_v47 = vmul.f32 %v871_v43, %v871_v43 }
 0x345   :  { %v861_v48 = vsub.f32 %v853_v41, %v823_v45  ;;  %892 = vadd.xlane.f32.xlu1 %v891_v46  ;;  %v874_v49 = vmul.f32 %v983_v32, %v862_v44 }
 0x346   :  { %v888_v50 = vsel %vm887_vm3, %v879_v47, 0.0 }
 0x347   :  { %889 = vadd.xlane.f32.xlu0 %v888_v50  ;;  %v882_v51 = vmul.f32 %v874_v49, %v874_v49  ;;  %v873_v52 = vmul.f32 %v983_v32, %v861_v48 }
 0x348   :  { %v1180_v53 = vpop.f32.mrf.mxu1 }
 0x349   :  { %v838_v55 = vadd.f32 %v1180_v53, %v982_v28  ;;  %v897_v56 = vsel %vm887_vm3, %v882_v51, 0.0  ;;  %v881_v57 = vmul.f32 %v873_v52, %v873_v52 }
 0x34a   :  { %898 = vadd.xlane.f32.xlu1 %v897_v56  ;;  %v832_v59 = vpop.f32.mrf.mxu1 }
 0x34b   :  { %v864_v61 = vsub.f32 %v856_v54, %v838_v55  ;;  %v833_v62 = vadd.f32 %v982_v28, %v832_v59  ;;  %v894_v3 = vsel %vm887_vm3, %v881_v57, 0.0 }
 0x34c   :  { %895 = vadd.xlane.f32.xlu0 %v894_v3 }
 0x34d   :  { %v863_v5 = vsub.f32 %v855_v60, %v833_v62  ;;  %v876_v6 = vmul.f32 %v983_v32, %v864_v61 }
 0x34f   :  { %v884_v1 = vmul.f32 %v876_v6, %v876_v6  ;;  %v875_v58 = vmul.f32 %v983_v32, %v863_v5 }
 0x350   :  { %v1183_v7 = vpop.f32.mrf.mxu1 }
 0x351   :  { %v848_v2 = vadd.f32 %v1183_v7, %v982_v28  ;;  %v903_v63 = vsel %vm887_vm3, %v884_v1, 0.0  ;;  %v883_v10 = vmul.f32 %v875_v58, %v875_v58 }
 0x352   :  { %904 = vadd.xlane.f32.xlu1 %v903_v63  ;;  %v842_v12 = vpop.f32.mrf.mxu1 }
 0x353   :  { %v866_v14 = vsub.f32 %v858_v8, %v848_v2  ;;  %v843_v15 = vadd.f32 %v982_v28, %v842_v12  ;;  %v900_v0 = vsel %vm887_vm3, %v883_v10, 0.0 }
 0x354   :  { %901 = vadd.xlane.f32.xlu0 %v900_v0 }
 0x355   :  { %v865_v4 = vsub.f32 %v857_v13, %v843_v15  ;;  %v878_v18 = vmul.f32 %v983_v32, %v866_v14 }
 0x357   :  { %v886_v19 = vmul.f32 %v878_v18, %v878_v18  ;;  %v877_v20 = vmul.f32 %v983_v32, %v865_v4 }
 0x359   :  { %v909_v21 = vsel %vm887_vm3, %v886_v19, 0.0  ;;  %v885_v9 = vmul.f32 %v877_v20, %v877_v20 }
 0x35a   :  { %910 = vadd.xlane.f32.xlu1 %v909_v21 }
 0x35b   :  { %v906_v11 = vsel %vm887_vm3, %v885_v9, 0.0 }
 0x35c   :  { %907 = vadd.xlane.f32.xlu0 %v906_v11 }
 0x3ce   :  { %v893_v26 = vpop.xlane.xlu1 %892 }
 0x3cf   :  { %v916_v27 = vsel %vm914_vm4, %v893_v26, %v1483_v29 }
 0x3d0   :  { %924 = vst [vmem:[#allocation5 + $0x8] sm:$0xff] %v916_v27  ;;  %v890_v16 = vpop.xlane.xlu0 %889 }
 0x3d1   :  { %v915_v17 = vsel %vm914_vm4, %v890_v16, %v1492_v34 }
 0x3d2   :  { %923 = vst [vmem:[#allocation5] sm:$0xff] %v915_v17 }
 0x3d3   :  { %v899_v28 = vpop.xlane.xlu1 %898 }
 0x3d4   :  { %v918_v24 = vsel %vm914_vm4, %v899_v28, %v1498_v39 }
 0x3d5   :  { %926 = vst [vmem:[#allocation5 + $0x18] sm:$0xff] %v918_v24  ;;  %v896_v25 = vpop.xlane.xlu0 %895 }
 0x3d6   :  { %v917_v30 = vsel %vm914_vm4, %v896_v25, %v823_v45 }
 0x3d7   :  { %925 = vst [vmem:[#allocation5 + $0x10] sm:$0xff] %v917_v30 }
 0x3db   :  { %v905_v31 = vpop.xlane.xlu1 %904 }
 0x3dc   :  { %v920_v32 = vsel %vm914_vm4, %v905_v31, %v838_v55 }
 0x3dd   :  { %928 = vst [vmem:[#allocation5 + $0x28] sm:$0xff] %v920_v32  ;;  %v902_v29 = vpop.xlane.xlu0 %901 }
 0x3de   :  { %v919_v33 = vsel %vm914_vm4, %v902_v29, %v833_v62 }
 0x3df   :  { %927 = vst [vmem:[#allocation5 + $0x20] sm:$0xff] %v919_v33 }
 0x3e3   :  { %v911_v34 = vpop.xlane.xlu1 %910 }
 0x3e4   :  { %v922_v35 = vsel %vm914_vm4, %v911_v34, %v848_v2 }
 0x3e5   :  { %930 = vst [vmem:[#allocation5 + $0x38] sm:$0xff] %v922_v35  ;;  %v908_v36 = vpop.xlane.xlu0 %907 }
 0x3e6   :  { %v921_v37 = vsel %vm914_vm4, %v908_v36, %v843_v15 }
 0x3e7   :  { %929 = vst [vmem:[#allocation5 + $0x30] sm:$0xff] %v921_v37 }
 0x3e8   :  { %1267 = shalt.err (!%p1264_p9)
}
 0x3e9   :  { %942 = dma.vmem_to_hbm [thread:$0]  %s937_s29, 1024, %s1546_s5, [#allocation4], %s1281_s21, %s1281_s21, %s1282_s22  }
 0x3ea   :  { %1278 = dma.done.wait [#allocation4], 1024  }
 0x3eb   :  { %1279 = vsyncadd [#allocation4], 4294966272 }
 0x3ec   :  { %946 = vsyncpa [#allocation3], 1 }
 0x3ed   :  { %947 = vsyncpa [#allocation4], 1 }

// kernel: tpu_custom_call.1
= control target key start
LH: loop header
LB: loop body
LE: loop exit
PB: predicated region body
PF: predicated region fallthrough
CT: control target
= control target key end

     0   :  { %10 = vsyncpa [#allocation3], 0  ;;  %s1541_s0 = inlined_call_operand.vmem [shape: f32[64,48], index: 0, kind: input, shape index: {}]   ;;  %s1542_s1 = inlined_call_operand.vmem [shape: f32[64,12], index: 1, kind: input, shape index: {}]   ;;  %s1543_s2 = inlined_call_operand.vmem [shape: f32[64,8], index: 2, kind: input, shape index: {}]   ;;  %s1544_s3 = inlined_call_operand.hbm [shape: f32[320,128], index: 3, kind: input, shape index: {}]   ;;  %s1545_s4 = inlined_call_operand.vmem [shape: f32[8,128], index: 4, kind: input, shape index: {}]   ;;  %s1546_s5 = inlined_call_operand.hbm [shape: f32[64,128], index: 5, kind: output, shape index: {}]  }
   0x1   :  { %11 = vsyncpa [#allocation4], 0  ;;  %s1280_s18 = smov [#allocation2]  }
   0x2   :  { %s23_s19 = sshll.u32 %s1280_s18, 4  ;;  %s24_s19 = int_to_ptr.vmem [resolvable:$true] %s23_s19 }
   0x3   :  { %s1244_s20 = scalar_lea.vmem %s24_s19, 5120  ;;  %p1249_p1 = scmp.lt.s32.totalorder %s24_s19, %s24_s19 }
   0x4   :  { %p1245_p0 = scmp.ne.s32.totalorder %s24_s19, %s1244_s20  ;;  %p1250_p2 = scmp.lt.s32.totalorder %s1244_s20, %s1244_s20 }
   0x6   :  { %p1251_p3 = por %p1250_p2, %p1249_p1 }
   0x8   :  { %p1252_p4 = pnand %p1251_p3, %p1245_p0 }
   0xa   :  { %1255 = shalt.err (!%p1252_p4)
}
   0xb   :  { %s1281_s21 = smov 128   ;;  %s1282_s22 = smov 8  }
   0xc   :  { %29 = dma.hbm_to_vmem [thread:$0]  %s1544_s3, 5120, %s24_s19, [#allocation3], %s1281_s21, %s1281_s21, %s1282_s22  }
   0xd   :  { %1276 = dma.done.wait [#allocation3], 5120  }
   0xe   :  { %1277 = vsyncadd [#allocation3], 4294962176  ;;  %vm43_vm0 = vcmask 392192   ;;  %v1323_v0 = vld [vmem:[%s1541_s0 + $0x18] sm:$0xff]  ;;  %v1328_v1 = vld [vmem:[%s1541_s0] sm:$0xff]  ;;  %vm225_vm1 = vcmask 97280  }
   0xf   :  { %v1333_v2 = vld [vmem:[%s1541_s0 + $0x8] sm:$0xff]  ;;  %v53_v3 = vsel %vm43_vm0, %v1323_v0, 0.0  ;;  %v44_v4 = vsel %vm43_vm0, %v1328_v1, 0.0  ;;  %v77_v5 = vmul.f32 %v1328_v1, %v1328_v1  ;;  %v1349_v9 = vld [vmem:[%s1541_s0 + $0x10] sm:$0xff]  ;;  %v80_v12 = vmul.f32 %v1323_v0, %v1323_v0  ;;  %v1368_v17 = vld [vmem:[%s1541_s0 + $0x20] sm:$0xff] }
  0x10   :  { %54 = vadd.xlane.f32.xlu1 %v53_v3  ;;  %45 = vadd.xlane.f32.xlu0 %v44_v4  ;;  %v47_v7 = vsel %vm43_vm0, %v1333_v2, 0.0  ;;  %v78_v8 = vmul.f32 %v1333_v2, %v1333_v2  ;;  %v50_v11 = vsel %vm43_vm0, %v1349_v9, 0.0  ;;  %v79_v13 = vmul.f32 %v1349_v9, %v1349_v9  ;;  %v1363_v16 = vld [vmem:[%s1541_s0 + $0x28] sm:$0xff]  ;;  %v1383_v24 = vld [vmem:[%s1541_s0 + $0x38] sm:$0xff]  ;;  %v1388_v25 = vld [vmem:[%s1541_s0 + $0x30] sm:$0xff] }
  0x11   :  { %v85_v6 = vsel %vm43_vm0, %v77_v5, 0.0  ;;  %v94_v14 = vsel %vm43_vm0, %v80_v12, 0.0  ;;  %v59_v18 = vsel %vm43_vm0, %v1363_v16, 0.0  ;;  %v56_v19 = vsel %vm43_vm0, %v1368_v17, 0.0  ;;  %v178_v32 = vld [vmem:[#allocation2 + $0x28] sm:$0xff]  ;;  %v177_v33 = vld [vmem:[#allocation2 + $0x20] sm:$0xff] }
  0x12   :  { %v88_v10 = vsel %vm43_vm0, %v78_v8, 0.0  ;;  %v91_v15 = vsel %vm43_vm0, %v79_v13, 0.0  ;;  %v82_v20 = vmul.f32 %v1363_v16, %v1363_v16  ;;  %v81_v21 = vmul.f32 %v1368_v17, %v1368_v17  ;;  %1072 = vmatprep.subr.mxu1 %v178_v32  ;;  %v176_v34 = vld [vmem:[#allocation2 + $0x18] sm:$0xff]  ;;  %v175_v35 = vld [vmem:[#allocation2 + $0x10] sm:$0xff]  ;;  %v174_v37 = vld [vmem:[#allocation2 + $0x8] sm:$0xff] }
  0x13   :  { %v65_v26 = vsel %vm43_vm0, %v1383_v24, 0.0  ;;  %v62_v27 = vsel %vm43_vm0, %v1388_v25, 0.0  ;;  %v84_v28 = vmul.f32 %v1383_v24, %v1383_v24  ;;  %v83_v29 = vmul.f32 %v1388_v25, %v1388_v25  ;;  %1073 = vmatpush3.msra.mxu1 %v178_v32  ;;  %v180_v36 = vld [vmem:[#allocation2 + $0x38] sm:$0xff]  ;;  %v179_v38 = vld [vmem:[#allocation2 + $0x30] sm:$0xff]  ;;  %v173_v39 = vld [vmem:[#allocation2] sm:$0xff] }
  0x14   :  { %86 = vadd.xlane.f32.xlu1 %v85_v6  ;;  %48 = vadd.xlane.f32.xlu0 %v47_v7  ;;  %v100_v22 = vsel %vm43_vm0, %v82_v20, 0.0  ;;  %v97_v23 = vsel %vm43_vm0, %v81_v21, 0.0  ;;  %v217_v40 = vld [vmem:[%s1542_s1] sm:$0xff]  ;;  %vm234_vm2 = vcmask 130048   ;;  %v218_v42 = vld [vmem:[%s1542_s1 + $0x8] sm:$0xff]  ;;  %v219_v44 = vld [vmem:[%s1542_s1 + $0x10] sm:$0xff] }
  0x15   :  { %v106_v30 = vsel %vm43_vm0, %v84_v28, 0.0  ;;  %v103_v31 = vsel %vm43_vm0, %v83_v29, 0.0  ;;  %1074 = vmatprep.subr.mxu1 %v177_v33  ;;  %1056 = vmatprep.subr.mxu0 %v180_v36  ;;  %v226_v41 = vsel %vm225_vm1, %v217_v40, 0.0  ;;  %v227_v43 = vsel %vm225_vm1, %v218_v42, 0.0  ;;  %v220_v46 = vld [vmem:[%s1542_s1 + $0x18] sm:$0xff]  ;;  %v221_v48 = vld [vmem:[%s1542_s1 + $0x20] sm:$0xff] }
  0x16   :  { %1075 = vmatpush3.msra.mxu1 %v177_v33  ;;  %1057 = vmatpush3.msra.mxu0 %v180_v36  ;;  %v228_v45 = vsel %vm225_vm1, %v219_v44, 0.0  ;;  %v229_v47 = vsel %vm225_vm1, %v220_v46, 0.0  ;;  %v230_v49 = vsel %vm225_vm1, %v221_v48, 0.0  ;;  %v222_v50 = vld [vmem:[%s1542_s1 + $0x28] sm:$0xff]  ;;  %v223_v52 = vld [vmem:[%s1542_s1 + $0x30] sm:$0xff]  ;;  %v224_v53 = vld [vmem:[%s1542_s1 + $0x38] sm:$0xff] }
  0x17   :  { %1076 = vmatprep.subr.mxu1 %v176_v34  ;;  %1058 = vmatprep.subr.mxu0 %v179_v38  ;;  %v231_v51 = vsel %vm225_vm1, %v222_v50, 0.0  ;;  %v232_v54 = vsel %vm225_vm1, %v223_v52, 0.0  ;;  %v233_v55 = vsel %vm225_vm1, %v224_v53, 0.0 }
  0x18   :  { %89 = vadd.xlane.f32.xlu1 %v88_v10  ;;  %51 = vadd.xlane.f32.xlu0 %v50_v11 }
  0x19   :  { %1077 = vmatpush3.msra.mxu1 %v176_v34  ;;  %1059 = vmatpush3.msra.mxu0 %v179_v38 }
  0x1a   :  { %1078 = vmatprep.subr.mxu1 %v175_v35  ;;  %1060 = vmatprep.mubr.msk.f32.mxu0 %vm234_vm2, %v226_v41 }
  0x1b   :  { %1079 = vmatpush3.msra.mxu1 %v175_v35  ;;  %1061 = vmatmul.mubr.msk.f32.vlgmr.msra.gmra.mxu0 %vm234_vm2, %v227_v43 }
  0x1c   :  { %95 = vadd.xlane.f32.xlu1 %v94_v14  ;;  %92 = vadd.xlane.f32.xlu0 %v91_v15 }
  0x1d   :  { %1080 = vmatprep.subr.mxu1 %v174_v37  ;;  %1063 = vmatprep.mubr.msk.f32.mxu0 %vm234_vm2, %v228_v45 }
  0x1e   :  { %1081 = vmatpush3.msra.mxu1 %v174_v37 }
  0x1f   :  { %1082 = vmatprep.subr.mxu1 %v173_v39  ;;  %1064 = vmatmul.mubr.msk.f32.gmra.mxu0 %vm234_vm2, %v229_v47 }
  0x20   :  { %60 = vadd.xlane.f32.xlu1 %v59_v18  ;;  %57 = vadd.xlane.f32.xlu0 %v56_v19 }
  0x21   :  { %1083 = vmatpush3.msra.mxu1 %v173_v39  ;;  %1066 = vmatprep.mubr.msk.f32.mxu0 %vm234_vm2, %v230_v49 }
  0x23   :  { %1067 = vmatmul.mubr.msk.f32.gmra.mxu0 %vm234_vm2, %v231_v51 }
  0x24   :  { %101 = vadd.xlane.f32.xlu1 %v100_v22  ;;  %98 = vadd.xlane.f32.xlu0 %v97_v23 }
  0x25   :  { %1069 = vmatprep.mubr.msk.f32.mxu0 %vm234_vm2, %v232_v54 }
  0x27   :  { %1070 = vmatmul.mubr.msk.f32.gmra.mxu0 %vm234_vm2, %v233_v55 }
  0x28   :  { %66 = vadd.xlane.f32.xlu1 %v65_v26  ;;  %63 = vadd.xlane.f32.xlu0 %v62_v27 }
  0x2c   :  { %107 = vadd.xlane.f32.xlu1 %v106_v30  ;;  %104 = vadd.xlane.f32.xlu0 %v103_v31 }
  0x99   :  { %v55_v56 = vpop.xlane.xlu1 %54  ;;  %v46_v57 = vpop.xlane.xlu0 %45 }
  0x9a   :  { %v69_v58 = vmul.f32 0.020833334, %v46_v57  ;;  %v1442_v4 = vmul.f32 0.020833334, %v55_v56 }
  0x9c   :  { %v117_v61 = vmul.f32 %v69_v58, %v69_v58  ;;  %v120_v14 = vmul.f32 %v1442_v4, %v1442_v4  ;;  %v141_v51 = vsub.f32 %v1328_v1, %v69_v58  ;;  %v144_v58 = vsub.f32 %v1323_v0, %v1442_v4 }
  0x9d   :  { %v87_v59 = vpop.xlane.xlu1 %86  ;;  %v49_v60 = vpop.xlane.xlu0 %48 }
  0x9e   :  { %v109_v62 = vmul.f32 0.020833334, %v87_v59  ;;  %v1440_v63 = vmul.f32 0.020833334, %v49_v60 }
  0xa0   :  { %v125_v3 = vsub.f32 %v109_v62, %v117_v61  ;;  %v118_v8 = vmul.f32 %v1440_v63, %v1440_v63  ;;  %v142_v55 = vsub.f32 %v1333_v2, %v1440_v63 }
  0xa1   :  { %v90_v5 = vpop.xlane.xlu1 %89  ;;  %v52_v6 = vpop.xlane.xlu0 %51 }
  0xa2   :  { %v133_v7 = vmax.f32 %v125_v3, 0.0  ;;  %v110_v10 = vmul.f32 0.020833334, %v90_v5  ;;  %v1446_v11 = vmul.f32 0.020833334, %v52_v6 }
  0xa4   :  { %v149_v12 = vadd.f32 1e-06, %v133_v7  ;;  %v126_v13 = vsub.f32 %v110_v10, %v118_v8  ;;  %v119_v15 = vmul.f32 %v1446_v11, %v1446_v11  ;;  %v143_v63 = vsub.f32 %v1349_v9, %v1446_v11 }
  0xa5   :  { %v96_v18 = vpop.xlane.xlu1 %95  ;;  %v93_v19 = vpop.xlane.xlu0 %92 }
  0xa6   :  { %1188 = vrsqrt.f32 %v149_v12  ;;  %v134_v20 = vmax.f32 %v126_v13, 0.0  ;;  %v112_v21 = vmul.f32 0.020833334, %v96_v18  ;;  %v111_v22 = vmul.f32 0.020833334, %v93_v19 }
  0xa8   :  { %v150_v23 = vadd.f32 1e-06, %v134_v20  ;;  %v128_v26 = vsub.f32 %v112_v21, %v120_v14  ;;  %v127_v27 = vsub.f32 %v111_v22, %v119_v15 }
  0xa9   :  { %v61_v28 = vpop.xlane.xlu1 %60  ;;  %v58_v29 = vpop.xlane.xlu0 %57 }
  0xaa   :  { %1190 = vrsqrt.f32 %v150_v23  ;;  %v136_v30 = vmax.f32 %v128_v26, 0.0  ;;  %v135_v31 = vmax.f32 %v127_v27, 0.0  ;;  %v74_v32 = vmul.f32 0.020833334, %v61_v28  ;;  %v194_v28 = vld [vmem:[#allocation2 + $0xa8] sm:$0xff] }
  0xab   :  { %v73_v33 = vmul.f32 0.020833334, %v58_v29  ;;  %v191_v29 = vld [vmem:[#allocation2 + $0x90] sm:$0xff] }
  0xac   :  { %v152_v34 = vadd.f32 1e-06, %v136_v30  ;;  %v151_v35 = vadd.f32 1e-06, %v135_v31  ;;  %v122_v36 = vmul.f32 %v74_v32, %v74_v32  ;;  %v146_v0 = vsub.f32 %v1363_v16, %v74_v32  ;;  %v196_v16 = vld [vmem:[#allocation2 + $0xb8] sm:$0xff]  ;;  %v190_v30 = vld [vmem:[#allocation2 + $0x88] sm:$0xff] }
  0xad   :  { %v102_v37 = vpop.xlane.xlu1 %101  ;;  %v99_v38 = vpop.xlane.xlu0 %98  ;;  %v121_v39 = vmul.f32 %v73_v33, %v73_v33  ;;  %v145_v18 = vsub.f32 %v1368_v17, %v73_v33  ;;  %1096 = vmatprep.subr.mxu0 %v196_v16  ;;  %v195_v17 = vld [vmem:[#allocation2 + $0xb0] sm:$0xff]  ;;  %v189_v31 = vld [vmem:[#allocation2 + $0x80] sm:$0xff]  ;;  %v188_v32 = vld [vmem:[#allocation2 + $0x78] sm:$0xff] }
  0xae   :  { %1192 = vrsqrt.f32 %v152_v34  ;;  %v114_v40 = vmul.f32 0.020833334, %v102_v37  ;;  %v113_v41 = vmul.f32 0.020833334, %v99_v38  ;;  %1097 = vmatpush3.msra.mxu0 %v196_v16  ;;  %v187_v33 = vld [vmem:[#allocation2 + $0x70] sm:$0xff]  ;;  %v186_v34 = vld [vmem:[#allocation2 + $0x68] sm:$0xff] }
  0xaf   :  { %1194 = vrsqrt.f32 %v151_v35  ;;  %1098 = vmatprep.subr.mxu0 %v195_v17  ;;  %v185_v35 = vld [vmem:[#allocation2 + $0x60] sm:$0xff]  ;;  %v183_v37 = vld [vmem:[#allocation2 + $0x50] sm:$0xff]  ;;  %v182_v38 = vld [vmem:[#allocation2 + $0x48] sm:$0xff] }
  0xb0   :  { %v130_v42 = vsub.f32 %v114_v40, %v122_v36  ;;  %v129_v43 = vsub.f32 %v113_v41, %v121_v39  ;;  %1099 = vmatpush3.msra.mxu0 %v195_v17  ;;  %v184_v36 = vld [vmem:[#allocation2 + $0x58] sm:$0xff]  ;;  %v181_v39 = vld [vmem:[#allocation2 + $0x40] sm:$0xff] }
  0xb1   :  { %v67_v44 = vpop.xlane.xlu1 %66  ;;  %v64_v45 = vpop.xlane.xlu0 %63  ;;  %1100 = vmatprep.subr.mxu0 %v194_v28  ;;  %v212_v40 = vld [vmem:[#allocation2 + $0x138] sm:$0xff] }
  0xb2   :  { %v138_v46 = vmax.f32 %v130_v42, 0.0  ;;  %v137_v47 = vmax.f32 %v129_v43, 0.0  ;;  %v76_v48 = vmul.f32 0.020833334, %v67_v44  ;;  %v75_v49 = vmul.f32 0.020833334, %v64_v45  ;;  %1101 = vmatpush3.msra.mxu0 %v194_v28  ;;  %1140 = vmatprep.subr.mxu1 %v212_v40 }
  0xb3   :  { %v1189_v50 = vpop.eup %1188  ;;  %v964_v43 = vld [vmem:[%s1545_s4] ss:$0 sm:$0xff] }
  0xb4   :  { %v154_v52 = vadd.f32 1e-06, %v138_v46  ;;  %v153_v53 = vadd.f32 1e-06, %v137_v47  ;;  %v124_v54 = vmul.f32 %v76_v48, %v76_v48  ;;  %v165_v59 = vmul.f32 %v1189_v50, %v141_v51 }
  0xb5   :  { %v108_v56 = vpop.xlane.xlu1 %107  ;;  %v105_v57 = vpop.xlane.xlu0 %104  ;;  %v123_v60 = vmul.f32 %v75_v49, %v75_v49  ;;  %v148_v9 = vsub.f32 %v1383_v24, %v76_v48  ;;  %v147_v22 = vsub.f32 %v1388_v25, %v75_v49  ;;  %v193_v24 = vld [vmem:[#allocation2 + $0xa0] sm:$0xff]  ;;  %v192_v25 = vld [vmem:[#allocation2 + $0x98] sm:$0xff] }
  0xb6   :  { %1196 = vrsqrt.f32 %v154_v52  ;;  %v116_v61 = vmul.f32 0.020833334, %v108_v56  ;;  %v115_v62 = vmul.f32 0.020833334, %v105_v57  ;;  %1084 = vmatprep.mubr.msk.f32.mxu1 %vm43_vm0, %v165_v59  ;;  %1102 = vmatprep.subr.mxu0 %v193_v24 }
  0xb7   :  { %v1191_v3 = vpop.eup %1190  ;;  %1198 = vrsqrt.f32 %v153_v53  ;;  %1103 = vmatpush3.msra.mxu0 %v193_v24 }
  0xb8   :  { %v132_v5 = vsub.f32 %v116_v61, %v124_v54  ;;  %v131_v6 = vsub.f32 %v115_v62, %v123_v60  ;;  %v166_v1 = vmul.f32 %v1191_v3, %v142_v55  ;;  %1104 = vmatprep.subr.mxu0 %v192_v25 }
  0xb9   :  { %1105 = vmatpush3.msra.mxu0 %v192_v25 }
  0xba   :  { %v140_v7 = vmax.f32 %v132_v5, 0.0  ;;  %v139_v8 = vmax.f32 %v131_v6, 0.0  ;;  %1085 = vmatmul.mubr.msk.f32.vlgmr.msra.gmra.mxu1 %vm43_vm0, %v166_v1  ;;  %1106 = vmatprep.subr.mxu0 %v191_v29 }
  0xbb   :  { %v1193_v2 = vpop.eup %1192  ;;  %1107 = vmatpush3.msra.mxu0 %v191_v29  ;;  %1141 = vmatpush3.msra.mxu1 %v212_v40 }
  0xbc   :  { %v1195_v10 = vpop.eup %1194  ;;  %v156_v12 = vadd.f32 1e-06, %v140_v7  ;;  %v155_v13 = vadd.f32 1e-06, %v139_v8  ;;  %v168_v14 = vmul.f32 %v1193_v2, %v144_v58  ;;  %1108 = vmatprep.subr.mxu0 %v190_v30 }
  0xbd   :  { %v167_v15 = vmul.f32 %v1195_v10, %v143_v63  ;;  %1109 = vmatpush3.msra.mxu0 %v190_v30 }
  0xbe   :  { %1200 = vrsqrt.f32 %v156_v12  ;;  %1110 = vmatprep.subr.mxu0 %v189_v31 }
  0xbf   :  { %1202 = vrsqrt.f32 %v155_v13  ;;  %1087 = vmatprep.mubr.msk.f32.mxu1 %vm43_vm0, %v167_v15  ;;  %1111 = vmatpush3.msra.mxu0 %v189_v31 }
  0xc0   :  { %1088 = vmatmul.mubr.msk.f32.gmra.mxu1 %vm43_vm0, %v168_v14  ;;  %1112 = vmatprep.subr.mxu0 %v188_v32 }
  0xc1   :  { %1113 = vmatpush3.msra.mxu0 %v188_v32 }
  0xc2   :  { %1114 = vmatprep.subr.mxu0 %v187_v33 }
  0xc3   :  { %v1197_v4 = vpop.eup %1196  ;;  %1115 = vmatpush3.msra.mxu0 %v187_v33 }
  0xc4   :  { %v1199_v19 = vpop.eup %1198  ;;  %v170_v20 = vmul.f32 %v1197_v4, %v146_v0  ;;  %1116 = vmatprep.subr.mxu0 %v186_v34 }
  0xc5   :  { %v169_v21 = vmul.f32 %v1199_v19, %v145_v18  ;;  %1117 = vmatpush3.msra.mxu0 %v186_v34 }
  0xc6   :  { %1118 = vmatprep.subr.mxu0 %v185_v35 }
  0xc7   :  { %1090 = vmatprep.mubr.msk.f32.mxu1 %vm43_vm0, %v169_v21  ;;  %1119 = vmatpush3.msra.mxu0 %v185_v35 }
  0xc8   :  { %1091 = vmatmul.mubr.msk.f32.gmra.mxu1 %vm43_vm0, %v170_v20  ;;  %1120 = vmatprep.subr.mxu0 %v184_v36 }
  0xc9   :  { %1121 = vmatpush3.msra.mxu0 %v184_v36 }
  0xca   :  { %1122 = vmatprep.subr.mxu0 %v183_v37 }
  0xcb   :  { %v1201_v11 = vpop.eup %1200  ;;  %1123 = vmatpush3.msra.mxu0 %v183_v37 }
  0xcc   :  { %v1203_v23 = vpop.eup %1202  ;;  %v172_v26 = vmul.f32 %v1201_v11, %v148_v9  ;;  %1124 = vmatprep.subr.mxu0 %v182_v38 }
  0xcd   :  { %v171_v27 = vmul.f32 %v1203_v23, %v147_v22  ;;  %1125 = vmatpush3.msra.mxu0 %v182_v38 }
  0xce   :  { %1126 = vmatprep.subr.mxu0 %v181_v39 }
  0xcf   :  { %1093 = vmatprep.mubr.msk.f32.mxu1 %vm43_vm0, %v171_v27  ;;  %1127 = vmatpush3.msra.mxu0 %v181_v39 }
  0xd0   :  { %1094 = vmatmul.mubr.msk.f32.gmra.mxu1 %vm43_vm0, %v172_v26 }
  0xdb   :  { %v1062_v41 = vpop.f32.mrf.mxu0 }
  0xdd   :  { %v325_v42 = vpop.f32.mrf.mxu0 }
  0xdf   :  { %v1065_v47 = vpop.f32.mrf.mxu0 }
  0xe1   :  { %v335_v53 = vpop.f32.mrf.mxu0 }
  0xe3   :  { %v1068_v62 = vpop.f32.mrf.mxu0 }
  0xe5   :  { %v345_v7 = vpop.f32.mrf.mxu0 }
  0xe7   :  { %v1071_v15 = vpop.f32.mrf.mxu0 }
  0xe9   :  { %v355_v22 = vpop.f32.mrf.mxu0 }
 0x17a   :  { %v1086_v44 = vpop.f32.mrf.mxu1 }
 0x17b   :  { %v460_v45 = vadd.f32 %v1086_v44, %v1062_v41 }
 0x17c   :  { %v454_v46 = vpop.f32.mrf.mxu1 }
 0x17d   :  { %v498_v48 = vadd.f32 %v964_v43, %v460_v45  ;;  %v455_v49 = vadd.f32 %v454_v46, %v325_v42 }
 0x17f   :  { %v506_v50 = vmin.f32 %v498_v48, 0.0  ;;  %v497_v51 = vadd.f32 %v964_v43, %v455_v49  ;;  %vm546_vm3 = vcmp.gt.f32.partialorder %v498_v48, 0.0 }
 0x180   :  { %v1089_v52 = vpop.f32.mrf.mxu1 }
 0x181   :  { %v515_v54 = vmul.f32 1.442695, %v506_v50  ;;  %v505_v55 = vmin.f32 %v497_v51, 0.0  ;;  %v470_v56 = vadd.f32 %v1089_v52, %v1065_v47  ;;  %vm545_vm4 = vcmp.gt.f32.partialorder %v497_v51, 0.0 }
 0x182   :  { %v464_v57 = vpop.f32.mrf.mxu1 }
 0x183   :  { %1204 = vpow2.f32 %v515_v54  ;;  %v513_v59 = vmul.f32 1.442695, %v505_v55  ;;  %v500_v60 = vadd.f32 %v964_v43, %v470_v56  ;;  %v465_v61 = vadd.f32 %v464_v57, %v335_v53 }
 0x185   :  { %1206 = vpow2.f32 %v513_v59  ;;  %v508_v3 = vmin.f32 %v500_v60, 0.0  ;;  %v499_v5 = vadd.f32 %v964_v43, %v465_v61  ;;  %vm548_vm5 = vcmp.gt.f32.partialorder %v500_v60, 0.0 }
 0x187   :  { %v519_v6 = vmul.f32 1.442695, %v508_v3  ;;  %v507_v1 = vmin.f32 %v499_v5, 0.0  ;;  %vm547_vm6 = vcmp.gt.f32.partialorder %v499_v5, 0.0 }
 0x188   :  { %v1092_v58 = vpop.f32.mrf.mxu1 }
 0x189   :  { %1208 = vpow2.f32 %v519_v6  ;;  %v517_v8 = vmul.f32 1.442695, %v507_v1  ;;  %v480_v2 = vadd.f32 %v1092_v58, %v1068_v62  ;;  %v211_v58 = vld [vmem:[#allocation2 + $0x130] sm:$0xff] }
 0x18a   :  { %v474_v63 = vpop.f32.mrf.mxu1  ;;  %1142 = vmatprep.subr.mxu1 %v211_v58 }
 0x18b   :  { %1210 = vpow2.f32 %v517_v8  ;;  %v502_v10 = vadd.f32 %v964_v43, %v480_v2  ;;  %v475_v12 = vadd.f32 %v474_v63, %v345_v7  ;;  %1143 = vmatpush3.msra.mxu1 %v211_v58  ;;  %v210_v7 = vld [vmem:[#allocation2 + $0x128] sm:$0xff]  ;;  %v209_v8 = vld [vmem:[#allocation2 + $0x120] sm:$0xff]  ;;  %v208_v2 = vld [vmem:[#allocation2 + $0x118] sm:$0xff] }
 0x18c   :  { %1144 = vmatprep.subr.mxu1 %v210_v7  ;;  %v207_v63 = vld [vmem:[#allocation2 + $0x110] sm:$0xff] }
 0x18d   :  { %v510_v13 = vmin.f32 %v502_v10, 0.0  ;;  %v501_v14 = vadd.f32 %v964_v43, %v475_v12  ;;  %vm550_vm7 = vcmp.gt.f32.partialorder %v502_v10, 0.0  ;;  %1145 = vmatpush3.msra.mxu1 %v210_v7  ;;  %v205_v12 = vld [vmem:[#allocation2 + $0x100] sm:$0xff] }
 0x18e   :  { %1146 = vmatprep.subr.mxu1 %v209_v8 }
 0x18f   :  { %v523_v0 = vmul.f32 1.442695, %v510_v13  ;;  %v509_v4 = vmin.f32 %v501_v14, 0.0  ;;  %vm549_vm8 = vcmp.gt.f32.partialorder %v501_v14, 0.0  ;;  %1147 = vmatpush3.msra.mxu1 %v209_v8  ;;  %v204_v13 = vld [vmem:[#allocation2 + $0xf8] sm:$0xff] }
 0x190   :  { %v1205_v18 = vpop.eup %1204  ;;  %v1095_v19 = vpop.f32.mrf.mxu1  ;;  %1148 = vmatprep.subr.mxu1 %v208_v2 }
 0x191   :  { %v966_v20 = vadd.f32 -1.0, %v1205_v18  ;;  %1212 = vpow2.f32 %v523_v0  ;;  %v521_v21 = vmul.f32 1.442695, %v509_v4  ;;  %v490_v9 = vadd.f32 %v1095_v19, %v1071_v15  ;;  %1149 = vmatpush3.msra.mxu1 %v208_v2  ;;  %v202_v15 = vld [vmem:[#allocation2 + $0xe8] sm:$0xff]  ;;  %v201_v0 = vld [vmem:[#allocation2 + $0xe0] sm:$0xff]  ;;  %v200_v4 = vld [vmem:[#allocation2 + $0xd8] sm:$0xff] }
 0x192   :  { %v1207_v11 = vpop.eup %1206  ;;  %v484_v23 = vpop.f32.mrf.mxu1  ;;  %1150 = vmatprep.subr.mxu1 %v207_v63  ;;  %v199_v18 = vld [vmem:[#allocation2 + $0xd0] sm:$0xff]  ;;  %v198_v19 = vld [vmem:[#allocation2 + $0xc8] sm:$0xff] }
 0x193   :  { %v538_v26 = vmul.f32 1.6732632, %v966_v20  ;;  %1214 = vpow2.f32 %v521_v21  ;;  %v504_v27 = vadd.f32 %v964_v43, %v490_v9  ;;  %v485_v16 = vadd.f32 %v484_v23, %v355_v22  ;;  %1151 = vmatpush3.msra.mxu1 %v207_v63  ;;  %v197_v20 = vld [vmem:[#allocation2 + $0xc0] sm:$0xff] }
 0x194   :  { %v965_v17 = vadd.f32 -1.0, %v1207_v11  ;;  %v973_v21 = vld [vmem:[%s1545_s4 + $0x1] ss:$0 sm:$0xff] }
 0x195   :  { %v512_v28 = vmin.f32 %v504_v27, 0.0  ;;  %v503_v24 = vadd.f32 %v964_v43, %v485_v16  ;;  %v554_v30 = vsel %vm546_vm3, %v498_v48, %v538_v26  ;;  %vm552_vm9 = vcmp.gt.f32.partialorder %v504_v27, 0.0 }
 0x196   :  { %v1209_v25 = vpop.eup %1208  ;;  %v537_v29 = vmul.f32 1.6732632, %v965_v17  ;;  %v562_v39 = vmul.f32 1.050701, %v554_v30  ;;  %vm887_vm3 = vcmask 64512  }
 0x197   :  { %v527_v31 = vmul.f32 1.442695, %v512_v28  ;;  %v511_v32 = vmin.f32 %v503_v24, 0.0  ;;  %v968_v33 = vadd.f32 -1.0, %v1209_v25  ;;  %vm551_vm10 = vcmp.gt.f32.partialorder %v503_v24, 0.0 }
 0x198   :  { %v1211_v34 = vpop.eup %1210  ;;  %v553_v35 = vsel %vm545_vm4, %v497_v51, %v537_v29 }
 0x199   :  { %1216 = vpow2.f32 %v527_v31  ;;  %v525_v36 = vmul.f32 1.442695, %v511_v32  ;;  %v561_v37 = vmul.f32 1.050701, %v553_v35  ;;  %v967_v38 = vadd.f32 -1.0, %v1211_v34 }
 0x19a   :  { %v540_v40 = vmul.f32 1.6732632, %v968_v33 }
 0x19b   :  { %1218 = vpow2.f32 %v525_v36  ;;  %1128 = vmatprep.mubr.f32.mxu0 %v561_v37  ;;  %v539_v41 = vmul.f32 1.6732632, %v967_v38 }
 0x19c   :  { %1129 = vmatmul.mubr.f32.vlgmr.msra.gmra.mxu0 %v562_v39  ;;  %v556_v42 = vsel %vm548_vm5, %v500_v60, %v540_v40 }
 0x19d   :  { %v555_v43 = vsel %vm547_vm6, %v499_v5, %v539_v41  ;;  %v564_v46 = vmul.f32 1.050701, %v556_v42 }
 0x19e   :  { %v1213_v44 = vpop.eup %1212  ;;  %v563_v45 = vmul.f32 1.050701, %v555_v43 }
 0x19f   :  { %v970_v47 = vadd.f32 -1.0, %v1213_v44 }
 0x1a0   :  { %v1215_v48 = vpop.eup %1214  ;;  %1131 = vmatprep.mubr.f32.mxu0 %v563_v45 }
 0x1a1   :  { %1132 = vmatmul.mubr.f32.gmra.mxu0 %v564_v46  ;;  %v969_v49 = vadd.f32 -1.0, %v1215_v48  ;;  %v542_v50 = vmul.f32 1.6732632, %v970_v47 }
 0x1a3   :  { %v541_v51 = vmul.f32 1.6732632, %v969_v49  ;;  %v558_v52 = vsel %vm550_vm7, %v502_v10, %v542_v50  ;;  %v206_v10 = vld [vmem:[#allocation2 + $0x108] sm:$0xff] }
 0x1a4   :  { %v566_v56 = vmul.f32 1.050701, %v558_v52  ;;  %1152 = vmatprep.subr.mxu1 %v206_v10 }
 0x1a5   :  { %v557_v53 = vsel %vm549_vm8, %v501_v14, %v541_v51  ;;  %1153 = vmatpush3.msra.mxu1 %v206_v10  ;;  %v203_v14 = vld [vmem:[#allocation2 + $0xf0] sm:$0xff] }
 0x1a6   :  { %v1217_v54 = vpop.eup %1216  ;;  %v565_v55 = vmul.f32 1.050701, %v557_v53  ;;  %1154 = vmatprep.subr.mxu1 %v205_v12 }
 0x1a7   :  { %v972_v57 = vadd.f32 -1.0, %v1217_v54  ;;  %1155 = vmatpush3.msra.mxu1 %v205_v12 }
 0x1a8   :  { %v1219_v59 = vpop.eup %1218  ;;  %1134 = vmatprep.mubr.f32.mxu0 %v565_v55  ;;  %1156 = vmatprep.subr.mxu1 %v204_v13 }
 0x1a9   :  { %1135 = vmatmul.mubr.f32.gmra.mxu0 %v566_v56  ;;  %v971_v60 = vadd.f32 -1.0, %v1219_v59  ;;  %v544_v61 = vmul.f32 1.6732632, %v972_v57  ;;  %1157 = vmatpush3.msra.mxu1 %v204_v13 }
 0x1aa   :  { %1158 = vmatprep.subr.mxu1 %v203_v14 }
 0x1ab   :  { %v543_v62 = vmul.f32 1.6732632, %v971_v60  ;;  %v560_v3 = vsel %vm552_vm9, %v504_v27, %v544_v61  ;;  %1159 = vmatpush3.msra.mxu1 %v203_v14 }
 0x1ac   :  { %v568_v1 = vmul.f32 1.050701, %v560_v3  ;;  %1160 = vmatprep.subr.mxu1 %v202_v15 }
 0x1ad   :  { %v559_v5 = vsel %vm551_vm10, %v503_v24, %v543_v62  ;;  %1161 = vmatpush3.msra.mxu1 %v202_v15 }
 0x1ae   :  { %v567_v6 = vmul.f32 1.050701, %v559_v5  ;;  %1162 = vmatprep.subr.mxu1 %v201_v0 }
 0x1af   :  { %1163 = vmatpush3.msra.mxu1 %v201_v0 }
 0x1b0   :  { %1137 = vmatprep.mubr.f32.mxu0 %v567_v6  ;;  %1164 = vmatprep.subr.mxu1 %v200_v4 }
 0x1b1   :  { %1138 = vmatmul.mubr.f32.gmra.mxu0 %v568_v1  ;;  %1165 = vmatpush3.msra.mxu1 %v200_v4 }
 0x1b2   :  { %1166 = vmatprep.subr.mxu1 %v199_v18 }
 0x1b3   :  { %1167 = vmatpush3.msra.mxu1 %v199_v18 }
 0x1b4   :  { %1168 = vmatprep.subr.mxu1 %v198_v19 }
 0x1b5   :  { %1169 = vmatpush3.msra.mxu1 %v198_v19 }
 0x1b6   :  { %1170 = vmatprep.subr.mxu1 %v197_v20 }
 0x1b7   :  { %1171 = vmatpush3.msra.mxu1 %v197_v20 }
 0x25c   :  { %v1130_v9 = vpop.f32.mrf.mxu0 }
 0x25d   :  { %v645_v11 = vadd.f32 %v1130_v9, %v973_v21 }
 0x25e   :  { %v639_v22 = vpop.f32.mrf.mxu0 }
 0x25f   :  { %v679_v23 = vmin.f32 %v645_v11, 0.0  ;;  %v640_v26 = vadd.f32 %v973_v21, %v639_v22  ;;  %vm719_vm11 = vcmp.gt.f32.partialorder %v645_v11, 0.0 }
 0x261   :  { %v688_v27 = vmul.f32 1.442695, %v679_v23  ;;  %v678_v16 = vmin.f32 %v640_v26, 0.0  ;;  %v1133_v17 = vpop.f32.mrf.mxu0  ;;  %vm718_vm12 = vcmp.gt.f32.partialorder %v640_v26, 0.0 }
 0x262   :  { %v655_v28 = vadd.f32 %v1133_v17, %v973_v21 }
 0x263   :  { %1220 = vpow2.f32 %v688_v27  ;;  %v686_v24 = vmul.f32 1.442695, %v678_v16  ;;  %v649_v25 = vpop.f32.mrf.mxu0 }
 0x264   :  { %v681_v29 = vmin.f32 %v655_v28, 0.0  ;;  %v650_v30 = vadd.f32 %v973_v21, %v649_v25  ;;  %vm721_vm13 = vcmp.gt.f32.partialorder %v655_v28, 0.0  ;;  %v852_v25 = vld [vmem:[%s1543_s2 + $0x8] sm:$0xff] }
 0x265   :  { %1222 = vpow2.f32 %v686_v24 }
 0x266   :  { %v692_v31 = vmul.f32 1.442695, %v681_v29  ;;  %v680_v32 = vmin.f32 %v650_v30, 0.0  ;;  %vm720_vm14 = vcmp.gt.f32.partialorder %v650_v30, 0.0 }
 0x268   :  { %1224 = vpow2.f32 %v692_v31  ;;  %v690_v33 = vmul.f32 1.442695, %v680_v32  ;;  %v851_v31 = vld [vmem:[%s1543_s2] sm:$0xff] }
 0x269   :  { %v1136_v34 = vpop.f32.mrf.mxu0  ;;  %v983_v32 = vld [vmem:[%s1545_s4 + $0x3] ss:$0 sm:$0xff] }
 0x26a   :  { %1226 = vpow2.f32 %v690_v33  ;;  %v665_v35 = vadd.f32 %v1136_v34, %v973_v21 }
 0x26b   :  { %v659_v36 = vpop.f32.mrf.mxu0 }
 0x26c   :  { %v683_v37 = vmin.f32 %v665_v35, 0.0  ;;  %v660_v38 = vadd.f32 %v973_v21, %v659_v36  ;;  %vm723_vm15 = vcmp.gt.f32.partialorder %v665_v35, 0.0 }
 0x26e   :  { %v696_v39 = vmul.f32 1.442695, %v683_v37  ;;  %v682_v40 = vmin.f32 %v660_v38, 0.0  ;;  %vm722_vm0 = vcmp.gt.f32.partialorder %v660_v38, 0.0  ;;  %v854_v37 = vld [vmem:[%s1543_s2 + $0x18] sm:$0xff] }
 0x270   :  { %v1221_v41 = vpop.eup %1220  ;;  %1228 = vpow2.f32 %v696_v39  ;;  %v694_v42 = vmul.f32 1.442695, %v682_v40 }
 0x271   :  { %v975_v43 = vadd.f32 -1.0, %v1221_v41  ;;  %v1139_v44 = vpop.f32.mrf.mxu0  ;;  %v853_v41 = vld [vmem:[%s1543_s2 + $0x10] sm:$0xff] }
 0x272   :  { %v1223_v45 = vpop.eup %1222  ;;  %1230 = vpow2.f32 %v694_v42  ;;  %v675_v46 = vadd.f32 %v1139_v44, %v973_v21 }
 0x273   :  { %v711_v47 = vmul.f32 1.6732632, %v975_v43  ;;  %v669_v48 = vpop.f32.mrf.mxu0  ;;  %v974_v49 = vadd.f32 -1.0, %v1223_v45 }
 0x274   :  { %v685_v50 = vmin.f32 %v675_v46, 0.0  ;;  %v670_v51 = vadd.f32 %v973_v21, %v669_v48  ;;  %vm725_vm1 = vcmp.gt.f32.partialorder %v675_v46, 0.0 }
 0x275   :  { %v1225_v52 = vpop.eup %1224  ;;  %v710_v53 = vmul.f32 1.6732632, %v974_v49  ;;  %v727_v54 = vsel %vm719_vm11, %v645_v11, %v711_v47 }
 0x276   :  { %v700_v55 = vmul.f32 1.442695, %v685_v50  ;;  %v684_v56 = vmin.f32 %v670_v51, 0.0  ;;  %v977_v60 = vadd.f32 -1.0, %v1225_v52  ;;  %v735_v5 = vmul.f32 1.050701, %v727_v54 }
 0x277   :  { %v1227_v57 = vpop.eup %1226  ;;  %v726_v59 = vsel %vm718_vm12, %v640_v26, %v710_v53  ;;  %vm724_vm2 = vcmp.gt.f32.partialorder %v670_v51, 0.0  ;;  %v856_v54 = vld [vmem:[%s1543_s2 + $0x28] sm:$0xff] }
 0x278   :  { %1232 = vpow2.f32 %v700_v55  ;;  %v698_v61 = vmul.f32 1.442695, %v684_v56  ;;  %v734_v62 = vmul.f32 1.050701, %v726_v59  ;;  %v976_v3 = vadd.f32 -1.0, %v1227_v57 }
 0x279   :  { %v713_v6 = vmul.f32 1.6732632, %v977_v60  ;;  %v855_v60 = vld [vmem:[%s1543_s2 + $0x20] sm:$0xff] }
 0x27a   :  { %1234 = vpow2.f32 %v698_v61  ;;  %1172 = vmatprep.mubr.f32.mxu1 %v734_v62  ;;  %v712_v1 = vmul.f32 1.6732632, %v976_v3 }
 0x27b   :  { %1173 = vmatmul.mubr.f32.vlgmr.msra.gmra.mxu1 %v735_v5  ;;  %v729_v58 = vsel %vm721_vm13, %v655_v28, %v713_v6  ;;  %v982_v28 = vld [vmem:[%s1545_s4 + $0x2] ss:$0 sm:$0xff] }
 0x27c   :  { %v728_v7 = vsel %vm720_vm14, %v650_v30, %v712_v1  ;;  %v737_v63 = vmul.f32 1.050701, %v729_v58 }
 0x27d   :  { %v1229_v8 = vpop.eup %1228  ;;  %v736_v2 = vmul.f32 1.050701, %v728_v7 }
 0x27e   :  { %v979_v10 = vadd.f32 -1.0, %v1229_v8  ;;  %v858_v8 = vld [vmem:[%s1543_s2 + $0x38] sm:$0xff] }
 0x27f   :  { %v1231_v12 = vpop.eup %1230  ;;  %1175 = vmatprep.mubr.f32.mxu1 %v736_v2 }
 0x280   :  { %1176 = vmatmul.mubr.f32.gmra.mxu1 %v737_v63  ;;  %v978_v13 = vadd.f32 -1.0, %v1231_v12  ;;  %v715_v14 = vmul.f32 1.6732632, %v979_v10 }
 0x282   :  { %v714_v15 = vmul.f32 1.6732632, %v978_v13  ;;  %v731_v0 = vsel %vm723_vm15, %v665_v35, %v715_v14  ;;  %v857_v13 = vld [vmem:[%s1543_s2 + $0x30] sm:$0xff]  ;;  %s1283_s2 = smov [#allocation5]  }
 0x283   :  { %v739_v20 = vmul.f32 1.050701, %v731_v0  ;;  %s936_s29 = sshll.u32 %s1283_s2, 4  ;;  %s937_s29 = int_to_ptr.vmem [resolvable:$true] %s936_s29 }
 0x284   :  { %v730_v4 = vsel %vm722_vm0, %v660_v38, %v714_v15  ;;  %s1256_s30 = scalar_lea.vmem %s937_s29, 1024  ;;  %p1261_p6 = scmp.lt.s32.totalorder %s937_s29, %s937_s29 }
 0x285   :  { %v1233_v18 = vpop.eup %1232  ;;  %v738_v19 = vmul.f32 1.050701, %v730_v4  ;;  %p1257_p5 = scmp.ne.s32.totalorder %s937_s29, %s1256_s30  ;;  %p1262_p7 = scmp.lt.s32.totalorder %s1256_s30, %s1256_s30 }
 0x286   :  { %v981_v21 = vadd.f32 -1.0, %v1233_v18 }
 0x287   :  { %v1235_v9 = vpop.eup %1234  ;;  %1178 = vmatprep.mubr.f32.mxu1 %v738_v19  ;;  %p1263_p8 = por %p1262_p7, %p1261_p6 }
 0x288   :  { %1179 = vmatmul.mubr.f32.gmra.mxu1 %v739_v20  ;;  %v980_v11 = vadd.f32 -1.0, %v1235_v9  ;;  %v717_v22 = vmul.f32 1.6732632, %v981_v21 }
 0x289   :  { %p1264_p9 = pnand %p1263_p8, %p1257_p5 }
 0x28a   :  { %v716_v23 = vmul.f32 1.6732632, %v980_v11  ;;  %v733_v26 = vsel %vm725_vm1, %v675_v46, %v717_v22  ;;  %v912_v22 = vlaneseq }
 0x28b   :  { %v741_v17 = vmul.f32 1.050701, %v733_v26 }
 0x28c   :  { %v732_v27 = vsel %vm724_vm2, %v670_v51, %v716_v23  ;;  %v913_v23 = vand.u32 127, %v912_v22 }
 0x28d   :  { %v740_v16 = vmul.f32 1.050701, %v732_v27 }
 0x28e   :  { %vm914_vm4 = vcmp.eq.s32.totalorder %v913_v23, 9 }
 0x28f   :  { %1181 = vmatprep.mubr.f32.mxu1 %v740_v16 }
 0x290   :  { %1182 = vmatmul.mubr.f32.gmra.mxu1 %v741_v17 }
 0x33b   :  { %v1174_v24 = vpop.f32.mrf.mxu1 }
 0x33c   :  { %v1483_v29 = vadd.f32 %v1174_v24, %v982_v28 }
 0x33d   :  { %v812_v30 = vpop.f32.mrf.mxu1 }
 0x33e   :  { %v860_v33 = vsub.f32 %v852_v25, %v1483_v29  ;;  %v1492_v34 = vadd.f32 %v982_v28, %v812_v30 }
 0x340   :  { %v859_v35 = vsub.f32 %v851_v31, %v1492_v34  ;;  %v1177_v36 = vpop.f32.mrf.mxu1  ;;  %v872_v38 = vmul.f32 %v983_v32, %v860_v33 }
 0x341   :  { %v1498_v39 = vadd.f32 %v1177_v36, %v982_v28 }
 0x342   :  { %v822_v40 = vpop.f32.mrf.mxu1  ;;  %v880_v42 = vmul.f32 %v872_v38, %v872_v38  ;;  %v871_v43 = vmul.f32 %v983_v32, %v859_v35 }
 0x343   :  { %v862_v44 = vsub.f32 %v854_v37, %v1498_v39  ;;  %v823_v45 = vadd.f32 %v982_v28, %v822_v40 }
 0x344   :  { %v891_v46 = vsel %vm887_vm3, %v880_v42, 0.0  ;;  %v879_v47 = vmul.f32 %v871_v43, %v871_v43 }
 0x345   :  { %v861_v48 = vsub.f32 %v853_v41, %v823_v45  ;;  %892 = vadd.xlane.f32.xlu1 %v891_v46  ;;  %v874_v49 = vmul.f32 %v983_v32, %v862_v44 }
 0x346   :  { %v888_v50 = vsel %vm887_vm3, %v879_v47, 0.0 }
 0x347   :  { %889 = vadd.xlane.f32.xlu0 %v888_v50  ;;  %v882_v51 = vmul.f32 %v874_v49, %v874_v49  ;;  %v873_v52 = vmul.f32 %v983_v32, %v861_v48 }
 0x348   :  { %v1180_v53 = vpop.f32.mrf.mxu1 }
 0x349   :  { %v838_v55 = vadd.f32 %v1180_v53, %v982_v28  ;;  %v897_v56 = vsel %vm887_vm3, %v882_v51, 0.0  ;;  %v881_v57 = vmul.f32 %v873_v52, %v873_v52 }
 0x34a   :  { %898 = vadd.xlane.f32.xlu1 %v897_v56  ;;  %v832_v59 = vpop.f32.mrf.mxu1 }
 0x34b   :  { %v864_v61 = vsub.f32 %v856_v54, %v838_v55  ;;  %v833_v62 = vadd.f32 %v982_v28, %v832_v59  ;;  %v894_v3 = vsel %vm887_vm3, %v881_v57, 0.0 }
 0x34c   :  { %895 = vadd.xlane.f32.xlu0 %v894_v3 }
 0x34d   :  { %v863_v5 = vsub.f32 %v855_v60, %v833_v62  ;;  %v876_v6 = vmul.f32 %v983_v32, %v864_v61 }
 0x34f   :  { %v884_v1 = vmul.f32 %v876_v6, %v876_v6  ;;  %v875_v58 = vmul.f32 %v983_v32, %v863_v5 }
 0x350   :  { %v1183_v7 = vpop.f32.mrf.mxu1 }
 0x351   :  { %v848_v2 = vadd.f32 %v1183_v7, %v982_v28  ;;  %v903_v63 = vsel %vm887_vm3, %v884_v1, 0.0  ;;  %v883_v10 = vmul.f32 %v875_v58, %v875_v58 }
 0x352   :  { %904 = vadd.xlane.f32.xlu1 %v903_v63  ;;  %v842_v12 = vpop.f32.mrf.mxu1 }
 0x353   :  { %v866_v14 = vsub.f32 %v858_v8, %v848_v2  ;;  %v843_v15 = vadd.f32 %v982_v28, %v842_v12  ;;  %v900_v0 = vsel %vm887_vm3, %v883_v10, 0.0 }
 0x354   :  { %901 = vadd.xlane.f32.xlu0 %v900_v0 }
 0x355   :  { %v865_v4 = vsub.f32 %v857_v13, %v843_v15  ;;  %v878_v18 = vmul.f32 %v983_v32, %v866_v14 }
 0x357   :  { %v886_v19 = vmul.f32 %v878_v18, %v878_v18  ;;  %v877_v20 = vmul.f32 %v983_v32, %v865_v4 }
 0x359   :  { %v909_v21 = vsel %vm887_vm3, %v886_v19, 0.0  ;;  %v885_v9 = vmul.f32 %v877_v20, %v877_v20 }
 0x35a   :  { %910 = vadd.xlane.f32.xlu1 %v909_v21 }
 0x35b   :  { %v906_v11 = vsel %vm887_vm3, %v885_v9, 0.0 }
 0x35c   :  { %907 = vadd.xlane.f32.xlu0 %v906_v11 }
 0x3ce   :  { %v893_v26 = vpop.xlane.xlu1 %892 }
 0x3cf   :  { %v916_v27 = vsel %vm914_vm4, %v893_v26, %v1483_v29 }
 0x3d0   :  { %924 = vst [vmem:[#allocation5 + $0x8] sm:$0xff] %v916_v27  ;;  %v890_v16 = vpop.xlane.xlu0 %889 }
 0x3d1   :  { %v915_v17 = vsel %vm914_vm4, %v890_v16, %v1492_v34 }
 0x3d2   :  { %923 = vst [vmem:[#allocation5] sm:$0xff] %v915_v17 }
 0x3d3   :  { %v899_v28 = vpop.xlane.xlu1 %898 }
 0x3d4   :  { %v918_v24 = vsel %vm914_vm4, %v899_v28, %v1498_v39 }
 0x3d5   :  { %926 = vst [vmem:[#allocation5 + $0x18] sm:$0xff] %v918_v24  ;;  %v896_v25 = vpop.xlane.xlu0 %895 }
 0x3d6   :  { %v917_v30 = vsel %vm914_vm4, %v896_v25, %v823_v45 }
 0x3d7   :  { %925 = vst [vmem:[#allocation5 + $0x10] sm:$0xff] %v917_v30 }
 0x3db   :  { %v905_v31 = vpop.xlane.xlu1 %904 }
 0x3dc   :  { %v920_v32 = vsel %vm914_vm4, %v905_v31, %v838_v55 }
 0x3dd   :  { %928 = vst [vmem:[#allocation5 + $0x28] sm:$0xff] %v920_v32  ;;  %v902_v29 = vpop.xlane.xlu0 %901 }
 0x3de   :  { %v919_v33 = vsel %vm914_vm4, %v902_v29, %v833_v62 }
 0x3df   :  { %927 = vst [vmem:[#allocation5 + $0x20] sm:$0xff] %v919_v33 }
 0x3e3   :  { %v911_v34 = vpop.xlane.xlu1 %910 }
 0x3e4   :  { %v922_v35 = vsel %vm914_vm4, %v911_v34, %v848_v2 }
 0x3e5   :  { %930 = vst [vmem:[#allocation5 + $0x38] sm:$0xff] %v922_v35  ;;  %v908_v36 = vpop.xlane.xlu0 %907 }
 0x3e6   :  { %v921_v37 = vsel %vm914_vm4, %v908_v36, %v843_v15 }
 0x3e7   :  { %929 = vst [vmem:[#allocation5 + $0x30] sm:$0xff] %v921_v37 }
 0x3e8   :  { %1267 = shalt.err (!%p1264_p9)
}
 0x3e9   :  { %942 = dma.vmem_to_hbm [thread:$0]  %s937_s29, 1024, %s1546_s5, [#allocation4], %s1281_s21, %s1281_s21, %s1282_s22  }
 0x3ea   :  { %1278 = dma.done.wait [#allocation4], 1024  }
 0x3eb   :  { %1279 = vsyncadd [#allocation4], 4294966272 }
 0x3ec   :  { %946 = vsyncpa [#allocation3], 1 }
 0x3ed   :  { %947 = vsyncpa [#allocation4], 1 }

</bundles_post_ra>
